<compile_context>
chip_gen: v5e
topology: v5e:2x2
jax: 0.10.0
libtpu: 0.0.40
codegen_flags: <defaults>
</compile_context>

<pallas_src>
import functools

import numpy as np

import jax
import jax.numpy as jnp
from jax import lax
from jax.experimental import pallas as pl
from jax.experimental.pallas import tpu as pltpu


# ------------------------------ fused kernel --------------------------------

def _nnbase_fused_kernel(x_ref, w1_ref, b1_ref, w2_ref, b2_ref,
                         fcw_ref, fcb_ref, g_ref, beta_ref, o_ref,
                         *, n_tap, n_pos, group, feat, eps):
    f32 = jnp.float32
    bf16 = jnp.bfloat16

    # ---- conv1 + ReLU: ONE K=36 matmul over all (tap, pos, batch) rows ----
    h1 = jnp.dot(x_ref[...], w1_ref[...], preferred_element_type=f32)
    h1 = jnp.maximum(h1 + b1_ref[...], 0.0)                 # (n_tap*n_pos*group, F1) f32

    # ---- conv2 + ReLU: 9 accumulating matmuls on static tap-major row slices ----
    r2 = n_pos * group                                       # conv2 output rows (pos-major)
    f2 = w2_ref.shape[-1]
    acc2 = jnp.zeros((r2, f2), f32)
    for t in range(n_tap):
        h1_t = h1[t * r2:(t + 1) * r2, :].astype(bf16)       # static, 8-aligned slice
        acc2 = acc2 + jnp.dot(h1_t, w2_ref[t], preferred_element_type=f32)
    h2 = jnp.maximum(acc2 + b2_ref[...], 0.0)                # (r2, F2) f32

    # ---- FC: 9 accumulating matmuls, one per conv2 spatial position.  NCHW
    # flatten order is folded into fcw slices; each pos is a static 8-row
    # (batch-group) slice of h2 -> no gather / selection matmul needed. ----
    featp = fcw_ref.shape[-1]
    y = jnp.zeros((group, featp), f32)
    for p in range(n_pos):
        h2_p = h2[p * group:(p + 1) * group, :].astype(bf16)
        y = y + jnp.dot(h2_p, fcw_ref[p], preferred_element_type=f32)
    y = y + fcb_ref[...]                                     # pad lanes stay exactly 0

    # ---- LayerNorm over the true `feat` lanes (masked two-pass) + tanh ----
    lane = lax.broadcasted_iota(jnp.int32, (group, featp), 1)
    mask = lane < feat
    mean = jnp.sum(y, axis=-1, keepdims=True) / float(feat)
    yc = jnp.where(mask, y - mean, 0.0)
    var = jnp.sum(yc * yc, axis=-1, keepdims=True) / float(feat)
    yn = yc * lax.rsqrt(var + eps)
    o_ref[...] = jnp.tanh(yn * g_ref[...] + beta_ref[...])


def _full_spec(shape):
    nd = len(shape)
    return pl.BlockSpec(shape, lambda i, nd=nd: (0,) * nd)


# -------------------- one-time parameter preparation (not hot path) ----------

def prepare_fused_params(params, obs_shape, *, ksize=3, stride=2, n_batch=2,
                         ln_eps=1e-5, feat_pad=128):
    """Fold im2col indices / NCHW flatten order / lane padding into constants
    (num_layers=2)."""
    c, h, w = obs_shape
    (w1, b1), (w2, b2) = params["convs"]                     # HWIO conv weights
    f1, f2 = w1.shape[-1], w2.shape[-1]
    oh1 = (h - ksize) // stride + 1                          # 7
    oh2 = (oh1 - ksize) // stride + 1                        # 3
    n_pos = oh2 * oh2                                        # 9 conv2 output positions
    n_tap = ksize * ksize                                    # 9 conv2 kernel taps
    group = 8                                                # sublane-aligned batch group
    assert n_batch <= group
    kdim = ksize * ksize * c                                 # 36 conv1 im2col features
    rows = n_tap * n_pos * group                             # 648

    # Gather indices into the flat input (one appended zero slot): row layout
    # is (tap-major, pos, batch-group-of-8); padding rows read the zero slot.
    zero_slot = n_batch * c * h * w
    idx = np.full((rows, kdim), zero_slot, dtype=np.int32)
    for t in range(n_tap):
        i, j = divmod(t, ksize)
        for p in range(n_pos):
            a, b = divmod(p, oh2)
            y0 = stride * (stride * a + i)                   # conv1 input row for this tap
            x0 = stride * (stride * b + j)
            for n in range(n_batch):
                r = (t * n_pos + p) * group + n
                k = 0
                for ki in range(ksize):
                    for kj in range(ksize):
                        for cc in range(c):
                            idx[r, k] = ((n * c + cc) * h + (y0 + ki)) * w + (x0 + kj)
                            k += 1

    feat = params["fc_w"].shape[1]
    # FC weight: PyTorch NCHW flatten (row = f2*n_pos + pos) resliced per pos,
    # lane-padded to feat_pad with zeros.
    fcw = jnp.transpose(params["fc_w"].reshape(f2, n_pos, feat), (1, 0, 2))
    fcw = jnp.pad(fcw, ((0, 0), (0, 0), (0, feat_pad - feat))).astype(jnp.bfloat16)

    def lane_pad(v):
        return jnp.pad(v, (0, feat_pad - feat)).reshape(1, feat_pad).astype(jnp.float32)

    taps = [(i, j) for i in range(ksize) for j in range(ksize)]
    return {
        "idx": jnp.asarray(idx), "n_batch": n_batch, "group": group,
        "n_tap": n_tap, "n_pos": n_pos, "feat": feat, "feat_pad": feat_pad,
        "eps": ln_eps,
        "w1": jnp.asarray(w1).reshape(kdim, f1).astype(jnp.bfloat16),   # (36, F1)
        "b1": b1.reshape(1, f1).astype(jnp.float32),
        "w2": jnp.stack([w2[i, j] for (i, j) in taps]).astype(jnp.bfloat16),  # (9, F1, F2)
        "b2": b2.reshape(1, f2).astype(jnp.float32),
        "fcw": fcw,                                                      # (9, F2, 128)
        "fcb": lane_pad(params["fc_b"]),
        "ln_g": lane_pad(params["ln_g"]),
        "ln_b": lane_pad(params["ln_b"]),
    }


# ------------------------------- forward pass --------------------------------

def nnbase_forward(obs, fused):
    """obs['birdview_image']: (N, C, H, W) float32 (NCHW, like PyTorch)."""
    x = obs["birdview_image"]
    n = x.shape[0]
    assert n == fused["n_batch"], "fused params were built for a different batch"

    # Single-gather im2col on the 8 KiB input, already expanded to conv2's
    # (tap, pos, batch) row layout, passed as bf16 (the only per-call operand).
    xf = jnp.concatenate([x.reshape(-1), jnp.zeros((1,), x.dtype)])
    x_rows = xf[fused["idx"]].astype(jnp.bfloat16)           # (648, 36)

    args = (x_rows, fused["w1"], fused["b1"], fused["w2"], fused["b2"],
            fused["fcw"], fused["fcb"], fused["ln_g"], fused["ln_b"])
    kernel = functools.partial(
        _nnbase_fused_kernel, n_tap=fused["n_tap"], n_pos=fused["n_pos"],
        group=fused["group"], feat=fused["feat"], eps=fused["eps"])
    # TODO(synk): `detach=True` is an autograd concept; no-op in this inference kernel.
    # TODO(synk): for large RL batches, add a leading "parallel" grid axis over
    # batch groups so both v7x TensorCores are used; at batch=2 the forward is a
    # single latency-bound grid step.
    out = pl.pallas_call(
        kernel,
        out_shape=jax.ShapeDtypeStruct((fused["group"], fused["feat_pad"]), jnp.float32),
        grid=(1,),
        in_specs=[_full_spec(a.shape) for a in args],
        out_specs=_full_spec((fused["group"], fused["feat_pad"])),
        compiler_params=pltpu.CompilerParams(dimension_semantics=("arbitrary",)),
    )(*args)
    return out[:n, :fused["feat"]]


# --------------------------- pure-JAX reference ------------------------------

def reference_forward(obs, params, stride=2):
    x = obs["birdview_image"]
    for w, b in params["convs"]:
        x = lax.conv_general_dilated(
            x, w, (stride, stride), "VALID",
            dimension_numbers=("NCHW", "HWIO", "NCHW")) + b.reshape(1, -1, 1, 1)
        x = jnp.maximum(x, 0.0)
    h = x.reshape(x.shape[0], -1)
    y = h @ params["fc_w"] + params["fc_b"]
    mean = y.mean(-1, keepdims=True)
    var = ((y - mean) ** 2).mean(-1, keepdims=True)
    yn = (y - mean) / jnp.sqrt(var + 1e-5)
    yn = yn * params["ln_g"] + params["ln_b"]
    return jnp.tanh(yn)


# ----------------------------------- main ------------------------------------

if __name__ == "__main__":
    # module config: obs_shape=(4,16,16), num_layers=2, num_filters=32, feature_dim=50
    C, H, W = 4, 16, 16
    num_filters, feature_dim, num_layers, stride, ksize = 32, 50, 2, 2, 3
    batch = 2

    # conv output spatial: 16 -> 7 -> 3  => out_dim = 32*3*3 = 288
    oh = H
    for _ in range(num_layers):
        oh = (oh - ksize) // stride + 1
    out_dim = num_filters * oh * oh

    key = jax.random.PRNGKey(0)
    k_obs, k_c1w, k_c1b, k_c2w, k_c2b, k_fcw, k_fcb = jax.random.split(key, 7)

    params = {
        "convs": [
            (0.1 * jax.random.normal(k_c1w, (ksize, ksize, C, num_filters), jnp.float32),
             0.1 * jax.random.normal(k_c1b, (num_filters,), jnp.float32)),
            (0.1 * jax.random.normal(k_c2w, (ksize, ksize, num_filters, num_filters), jnp.float32),
             0.1 * jax.random.normal(k_c2b, (num_filters,), jnp.float32)),
        ],
        "fc_w": 0.05 * jax.random.normal(k_fcw, (out_dim, feature_dim), jnp.float32),
        "fc_b": 0.05 * jax.random.normal(k_fcb, (feature_dim,), jnp.float32),
        "ln_g": jnp.ones((feature_dim,), jnp.float32),
        "ln_b": jnp.zeros((feature_dim,), jnp.float32),
    }

    obs = {"birdview_image": jax.random.normal(k_obs, (batch, C, H, W), jnp.float32)}

    fused = prepare_fused_params(params, (C, H, W), ksize=ksize, stride=stride,
                                 n_batch=batch)

    fwd = jax.jit(lambda img: nnbase_forward({"birdview_image": img}, fused))
    out = jax.block_until_ready(fwd(obs["birdview_image"]))
    ref = jax.block_until_ready(reference_forward(obs, params, stride))

    assert out.shape == (batch, feature_dim), out.shape
    max_err = float(jnp.max(jnp.abs(out - ref)))
    assert jnp.allclose(out, ref, rtol=3e-2, atol=3e-2), max_err

    print("KERNEL_OK")
</pallas_src>

<mosaic_0001>
module attributes {stable_mosaic.version = 11 : i64} {
  func.func @_nnbase_fused_kernel(%arg0: i32, %arg1: memref<648x36xbf16, #tpu.memory_space<vmem>>, %arg2: memref<36x32xbf16, #tpu.memory_space<vmem>>, %arg3: memref<1x32xf32, #tpu.memory_space<vmem>>, %arg4: memref<9x32x32xbf16, #tpu.memory_space<vmem>>, %arg5: memref<1x32xf32, #tpu.memory_space<vmem>>, %arg6: memref<9x32x128xbf16, #tpu.memory_space<vmem>>, %arg7: memref<1x128xf32, #tpu.memory_space<vmem>>, %arg8: memref<1x128xf32, #tpu.memory_space<vmem>>, %arg9: memref<1x128xf32, #tpu.memory_space<vmem>>, %arg10: memref<8x128xf32, #tpu.memory_space<vmem>>) attributes {dimension_semantics = [#tpu.dimension_semantics<arbitrary>], iteration_bounds = array<i64: 1>, scalar_prefetch = 0 : i64, scratch_operands = 0 : i64, tpu.core_type = #tpu.core_type<tc>, window_params = [{pipeline_mode = #tpu.pipeline_mode<synchronous>, transform_indices = @transform_0, window_bounds = array<i64: 648, 36>}, {pipeline_mode = #tpu.pipeline_mode<synchronous>, transform_indices = @transform_1, window_bounds = array<i64: 36, 32>}, {pipeline_mode = #tpu.pipeline_mode<synchronous>, transform_indices = @transform_2, window_bounds = array<i64: 1, 32>}, {pipeline_mode = #tpu.pipeline_mode<synchronous>, transform_indices = @transform_3, window_bounds = array<i64: 9, 32, 32>}, {pipeline_mode = #tpu.pipeline_mode<synchronous>, transform_indices = @transform_4, window_bounds = array<i64: 1, 32>}, {pipeline_mode = #tpu.pipeline_mode<synchronous>, transform_indices = @transform_5, window_bounds = array<i64: 9, 32, 128>}, {pipeline_mode = #tpu.pipeline_mode<synchronous>, transform_indices = @transform_6, window_bounds = array<i64: 1, 128>}, {pipeline_mode = #tpu.pipeline_mode<synchronous>, transform_indices = @transform_7, window_bounds = array<i64: 1, 128>}, {pipeline_mode = #tpu.pipeline_mode<synchronous>, transform_indices = @transform_8, window_bounds = array<i64: 1, 128>}, {pipeline_mode = #tpu.pipeline_mode<synchronous>, transform_indices = @transform_9, window_bounds = array<i64: 8, 128>}]} {
    %c0 = arith.constant 0 : index
    %c0_0 = arith.constant 0 : index
    %0 = vector.load %arg1[%c0, %c0_0] : memref<648x36xbf16, #tpu.memory_space<vmem>>, vector<648x36xbf16>
    %c0_1 = arith.constant 0 : index
    %c0_2 = arith.constant 0 : index
    %1 = vector.load %arg2[%c0_1, %c0_2] : memref<36x32xbf16, #tpu.memory_space<vmem>>, vector<36x32xbf16>
    %cst = arith.constant dense<0.000000e+00> : vector<648x32xf32>
    %2 = tpu.matmul %0, %1, %cst {dimension_numbers = #tpu.dot_dimension_numbers<[1], [0], [0], [1], [0, 0, 1, 1], [], []>} : vector<648x36xbf16>, vector<36x32xbf16>, vector<648x32xf32> -> vector<648x32xf32>
    %c0_3 = arith.constant 0 : index
    %c0_4 = arith.constant 0 : index
    %3 = vector.load %arg3[%c0_3, %c0_4] : memref<1x32xf32, #tpu.memory_space<vmem>>, vector<1x32xf32>
    %4 = vector.broadcast %3 : vector<1x32xf32> to vector<648x32xf32>
    %5 = arith.addf %2, %4 : vector<648x32xf32>
    %cst_5 = arith.constant 0.000000e+00 : f32
    %6 = vector.broadcast %cst_5 : f32 to vector<648x32xf32>
    %7 = arith.maximumf %5, %6 : vector<648x32xf32>
    %cst_6 = arith.constant 0.000000e+00 : f32
    %8 = vector.broadcast %cst_6 : f32 to vector<72x32xf32>
    %9 = vector.extract_strided_slice %7 {offsets = [0, 0], sizes = [72, 32], strides = [1, 1]} : vector<648x32xf32> to vector<72x32xf32>
    %10 = arith.truncf %9 : vector<72x32xf32> to vector<72x32xbf16>
    %c0_7 = arith.constant 0 : index
    %c0_8 = arith.constant 0 : index
    %c0_9 = arith.constant 0 : index
    %11 = vector.load %arg4[%c0_7, %c0_8, %c0_9] : memref<9x32x32xbf16, #tpu.memory_space<vmem>>, vector<1x32x32xbf16>
    %12 = vector.shape_cast %11 : vector<1x32x32xbf16> to vector<32x32xbf16>
    %cst_10 = arith.constant dense<0.000000e+00> : vector<72x32xf32>
    %13 = tpu.matmul %10, %12, %cst_10 {dimension_numbers = #tpu.dot_dimension_numbers<[1], [0], [0], [1], [0, 0, 1, 1], [], []>} : vector<72x32xbf16>, vector<32x32xbf16>, vector<72x32xf32> -> vector<72x32xf32>
    %14 = arith.addf %8, %13 : vector<72x32xf32>
    %15 = vector.extract_strided_slice %7 {offsets = [72, 0], sizes = [72, 32], strides = [1, 1]} : vector<648x32xf32> to vector<72x32xf32>
    %16 = arith.truncf %15 : vector<72x32xf32> to vector<72x32xbf16>
    %c1 = arith.constant 1 : index
    %c0_11 = arith.constant 0 : index
    %c0_12 = arith.constant 0 : index
    %17 = vector.load %arg4[%c1, %c0_11, %c0_12] : memref<9x32x32xbf16, #tpu.memory_space<vmem>>, vector<1x32x32xbf16>
    %18 = vector.shape_cast %17 : vector<1x32x32xbf16> to vector<32x32xbf16>
    %cst_13 = arith.constant dense<0.000000e+00> : vector<72x32xf32>
    %19 = tpu.matmul %16, %18, %cst_13 {dimension_numbers = #tpu.dot_dimension_numbers<[1], [0], [0], [1], [0, 0, 1, 1], [], []>} : vector<72x32xbf16>, vector<32x32xbf16>, vector<72x32xf32> -> vector<72x32xf32>
    %20 = arith.addf %14, %19 : vector<72x32xf32>
    %21 = vector.extract_strided_slice %7 {offsets = [144, 0], sizes = [72, 32], strides = [1, 1]} : vector<648x32xf32> to vector<72x32xf32>
    %22 = arith.truncf %21 : vector<72x32xf32> to vector<72x32xbf16>
    %c2 = arith.constant 2 : index
    %c0_14 = arith.constant 0 : index
    %c0_15 = arith.constant 0 : index
    %23 = vector.load %arg4[%c2, %c0_14, %c0_15] : memref<9x32x32xbf16, #tpu.memory_space<vmem>>, vector<1x32x32xbf16>
    %24 = vector.shape_cast %23 : vector<1x32x32xbf16> to vector<32x32xbf16>
    %cst_16 = arith.constant dense<0.000000e+00> : vector<72x32xf32>
    %25 = tpu.matmul %22, %24, %cst_16 {dimension_numbers = #tpu.dot_dimension_numbers<[1], [0], [0], [1], [0, 0, 1, 1], [], []>} : vector<72x32xbf16>, vector<32x32xbf16>, vector<72x32xf32> -> vector<72x32xf32>
    %26 = arith.addf %20, %25 : vector<72x32xf32>
    %27 = vector.extract_strided_slice %7 {offsets = [216, 0], sizes = [72, 32], strides = [1, 1]} : vector<648x32xf32> to vector<72x32xf32>
    %28 = arith.truncf %27 : vector<72x32xf32> to vector<72x32xbf16>
    %c3 = arith.constant 3 : index
    %c0_17 = arith.constant 0 : index
    %c0_18 = arith.constant 0 : index
    %29 = vector.load %arg4[%c3, %c0_17, %c0_18] : memref<9x32x32xbf16, #tpu.memory_space<vmem>>, vector<1x32x32xbf16>
    %30 = vector.shape_cast %29 : vector<1x32x32xbf16> to vector<32x32xbf16>
    %cst_19 = arith.constant dense<0.000000e+00> : vector<72x32xf32>
    %31 = tpu.matmul %28, %30, %cst_19 {dimension_numbers = #tpu.dot_dimension_numbers<[1], [0], [0], [1], [0, 0, 1, 1], [], []>} : vector<72x32xbf16>, vector<32x32xbf16>, vector<72x32xf32> -> vector<72x32xf32>
    %32 = arith.addf %26, %31 : vector<72x32xf32>
    %33 = vector.extract_strided_slice %7 {offsets = [288, 0], sizes = [72, 32], strides = [1, 1]} : vector<648x32xf32> to vector<72x32xf32>
    %34 = arith.truncf %33 : vector<72x32xf32> to vector<72x32xbf16>
    %c4 = arith.constant 4 : index
    %c0_20 = arith.constant 0 : index
    %c0_21 = arith.constant 0 : index
    %35 = vector.load %arg4[%c4, %c0_20, %c0_21] : memref<9x32x32xbf16, #tpu.memory_space<vmem>>, vector<1x32x32xbf16>
    %36 = vector.shape_cast %35 : vector<1x32x32xbf16> to vector<32x32xbf16>
    %cst_22 = arith.constant dense<0.000000e+00> : vector<72x32xf32>
    %37 = tpu.matmul %34, %36, %cst_22 {dimension_numbers = #tpu.dot_dimension_numbers<[1], [0], [0], [1], [0, 0, 1, 1], [], []>} : vector<72x32xbf16>, vector<32x32xbf16>, vector<72x32xf32> -> vector<72x32xf32>
    %38 = arith.addf %32, %37 : vector<72x32xf32>
    %39 = vector.extract_strided_slice %7 {offsets = [360, 0], sizes = [72, 32], strides = [1, 1]} : vector<648x32xf32> to vector<72x32xf32>
    %40 = arith.truncf %39 : vector<72x32xf32> to vector<72x32xbf16>
    %c5 = arith.constant 5 : index
    %c0_23 = arith.constant 0 : index
    %c0_24 = arith.constant 0 : index
    %41 = vector.load %arg4[%c5, %c0_23, %c0_24] : memref<9x32x32xbf16, #tpu.memory_space<vmem>>, vector<1x32x32xbf16>
    %42 = vector.shape_cast %41 : vector<1x32x32xbf16> to vector<32x32xbf16>
    %cst_25 = arith.constant dense<0.000000e+00> : vector<72x32xf32>
    %43 = tpu.matmul %40, %42, %cst_25 {dimension_numbers = #tpu.dot_dimension_numbers<[1], [0], [0], [1], [0, 0, 1, 1], [], []>} : vector<72x32xbf16>, vector<32x32xbf16>, vector<72x32xf32> -> vector<72x32xf32>
    %44 = arith.addf %38, %43 : vector<72x32xf32>
    %45 = vector.extract_strided_slice %7 {offsets = [432, 0], sizes = [72, 32], strides = [1, 1]} : vector<648x32xf32> to vector<72x32xf32>
    %46 = arith.truncf %45 : vector<72x32xf32> to vector<72x32xbf16>
    %c6 = arith.constant 6 : index
    %c0_26 = arith.constant 0 : index
    %c0_27 = arith.constant 0 : index
    %47 = vector.load %arg4[%c6, %c0_26, %c0_27] : memref<9x32x32xbf16, #tpu.memory_space<vmem>>, vector<1x32x32xbf16>
    %48 = vector.shape_cast %47 : vector<1x32x32xbf16> to vector<32x32xbf16>
    %cst_28 = arith.constant dense<0.000000e+00> : vector<72x32xf32>
    %49 = tpu.matmul %46, %48, %cst_28 {dimension_numbers = #tpu.dot_dimension_numbers<[1], [0], [0], [1], [0, 0, 1, 1], [], []>} : vector<72x32xbf16>, vector<32x32xbf16>, vector<72x32xf32> -> vector<72x32xf32>
    %50 = arith.addf %44, %49 : vector<72x32xf32>
    %51 = vector.extract_strided_slice %7 {offsets = [504, 0], sizes = [72, 32], strides = [1, 1]} : vector<648x32xf32> to vector<72x32xf32>
    %52 = arith.truncf %51 : vector<72x32xf32> to vector<72x32xbf16>
    %c7 = arith.constant 7 : index
    %c0_29 = arith.constant 0 : index
    %c0_30 = arith.constant 0 : index
    %53 = vector.load %arg4[%c7, %c0_29, %c0_30] : memref<9x32x32xbf16, #tpu.memory_space<vmem>>, vector<1x32x32xbf16>
    %54 = vector.shape_cast %53 : vector<1x32x32xbf16> to vector<32x32xbf16>
    %cst_31 = arith.constant dense<0.000000e+00> : vector<72x32xf32>
    %55 = tpu.matmul %52, %54, %cst_31 {dimension_numbers = #tpu.dot_dimension_numbers<[1], [0], [0], [1], [0, 0, 1, 1], [], []>} : vector<72x32xbf16>, vector<32x32xbf16>, vector<72x32xf32> -> vector<72x32xf32>
    %56 = arith.addf %50, %55 : vector<72x32xf32>
    %57 = vector.extract_strided_slice %7 {offsets = [576, 0], sizes = [72, 32], strides = [1, 1]} : vector<648x32xf32> to vector<72x32xf32>
    %58 = arith.truncf %57 : vector<72x32xf32> to vector<72x32xbf16>
    %c8 = arith.constant 8 : index
    %c0_32 = arith.constant 0 : index
    %c0_33 = arith.constant 0 : index
    %59 = vector.load %arg4[%c8, %c0_32, %c0_33] : memref<9x32x32xbf16, #tpu.memory_space<vmem>>, vector<1x32x32xbf16>
    %60 = vector.shape_cast %59 : vector<1x32x32xbf16> to vector<32x32xbf16>
    %cst_34 = arith.constant dense<0.000000e+00> : vector<72x32xf32>
    %61 = tpu.matmul %58, %60, %cst_34 {dimension_numbers = #tpu.dot_dimension_numbers<[1], [0], [0], [1], [0, 0, 1, 1], [], []>} : vector<72x32xbf16>, vector<32x32xbf16>, vector<72x32xf32> -> vector<72x32xf32>
    %62 = arith.addf %56, %61 : vector<72x32xf32>
    %c0_35 = arith.constant 0 : index
    %c0_36 = arith.constant 0 : index
    %63 = vector.load %arg5[%c0_35, %c0_36] : memref<1x32xf32, #tpu.memory_space<vmem>>, vector<1x32xf32>
    %64 = vector.broadcast %63 : vector<1x32xf32> to vector<72x32xf32>
    %65 = arith.addf %62, %64 : vector<72x32xf32>
    %cst_37 = arith.constant 0.000000e+00 : f32
    %66 = vector.broadcast %cst_37 : f32 to vector<72x32xf32>
    %67 = arith.maximumf %65, %66 : vector<72x32xf32>
    %cst_38 = arith.constant 0.000000e+00 : f32
    %68 = vector.broadcast %cst_38 : f32 to vector<8x128xf32>
    %69 = vector.extract_strided_slice %67 {offsets = [0, 0], sizes = [8, 32], strides = [1, 1]} : vector<72x32xf32> to vector<8x32xf32>
    %70 = arith.truncf %69 : vector<8x32xf32> to vector<8x32xbf16>
    %c0_39 = arith.constant 0 : index
    %c0_40 = arith.constant 0 : index
    %c0_41 = arith.constant 0 : index
    %71 = vector.load %arg6[%c0_39, %c0_40, %c0_41] : memref<9x32x128xbf16, #tpu.memory_space<vmem>>, vector<1x32x128xbf16>
    %72 = vector.shape_cast %71 : vector<1x32x128xbf16> to vector<32x128xbf16>
    %cst_42 = arith.constant dense<0.000000e+00> : vector<8x128xf32>
    %73 = tpu.matmul %70, %72, %cst_42 {dimension_numbers = #tpu.dot_dimension_numbers<[1], [0], [0], [1], [0, 0, 1, 1], [], []>} : vector<8x32xbf16>, vector<32x128xbf16>, vector<8x128xf32> -> vector<8x128xf32>
    %74 = arith.addf %68, %73 : vector<8x128xf32>
    %75 = vector.extract_strided_slice %67 {offsets = [8, 0], sizes = [8, 32], strides = [1, 1]} : vector<72x32xf32> to vector<8x32xf32>
    %76 = arith.truncf %75 : vector<8x32xf32> to vector<8x32xbf16>
    %c1_43 = arith.constant 1 : index
    %c0_44 = arith.constant 0 : index
    %c0_45 = arith.constant 0 : index
    %77 = vector.load %arg6[%c1_43, %c0_44, %c0_45] : memref<9x32x128xbf16, #tpu.memory_space<vmem>>, vector<1x32x128xbf16>
    %78 = vector.shape_cast %77 : vector<1x32x128xbf16> to vector<32x128xbf16>
    %cst_46 = arith.constant dense<0.000000e+00> : vector<8x128xf32>
    %79 = tpu.matmul %76, %78, %cst_46 {dimension_numbers = #tpu.dot_dimension_numbers<[1], [0], [0], [1], [0, 0, 1, 1], [], []>} : vector<8x32xbf16>, vector<32x128xbf16>, vector<8x128xf32> -> vector<8x128xf32>
    %80 = arith.addf %74, %79 : vector<8x128xf32>
    %81 = vector.extract_strided_slice %67 {offsets = [16, 0], sizes = [8, 32], strides = [1, 1]} : vector<72x32xf32> to vector<8x32xf32>
    %82 = arith.truncf %81 : vector<8x32xf32> to vector<8x32xbf16>
    %c2_47 = arith.constant 2 : index
    %c0_48 = arith.constant 0 : index
    %c0_49 = arith.constant 0 : index
    %83 = vector.load %arg6[%c2_47, %c0_48, %c0_49] : memref<9x32x128xbf16, #tpu.memory_space<vmem>>, vector<1x32x128xbf16>
    %84 = vector.shape_cast %83 : vector<1x32x128xbf16> to vector<32x128xbf16>
    %cst_50 = arith.constant dense<0.000000e+00> : vector<8x128xf32>
    %85 = tpu.matmul %82, %84, %cst_50 {dimension_numbers = #tpu.dot_dimension_numbers<[1], [0], [0], [1], [0, 0, 1, 1], [], []>} : vector<8x32xbf16>, vector<32x128xbf16>, vector<8x128xf32> -> vector<8x128xf32>
    %86 = arith.addf %80, %85 : vector<8x128xf32>
    %87 = vector.extract_strided_slice %67 {offsets = [24, 0], sizes = [8, 32], strides = [1, 1]} : vector<72x32xf32> to vector<8x32xf32>
    %88 = arith.truncf %87 : vector<8x32xf32> to vector<8x32xbf16>
    %c3_51 = arith.constant 3 : index
    %c0_52 = arith.constant 0 : index
    %c0_53 = arith.constant 0 : index
    %89 = vector.load %arg6[%c3_51, %c0_52, %c0_53] : memref<9x32x128xbf16, #tpu.memory_space<vmem>>, vector<1x32x128xbf16>
    %90 = vector.shape_cast %89 : vector<1x32x128xbf16> to vector<32x128xbf16>
    %cst_54 = arith.constant dense<0.000000e+00> : vector<8x128xf32>
    %91 = tpu.matmul %88, %90, %cst_54 {dimension_numbers = #tpu.dot_dimension_numbers<[1], [0], [0], [1], [0, 0, 1, 1], [], []>} : vector<8x32xbf16>, vector<32x128xbf16>, vector<8x128xf32> -> vector<8x128xf32>
    %92 = arith.addf %86, %91 : vector<8x128xf32>
    %93 = vector.extract_strided_slice %67 {offsets = [32, 0], sizes = [8, 32], strides = [1, 1]} : vector<72x32xf32> to vector<8x32xf32>
    %94 = arith.truncf %93 : vector<8x32xf32> to vector<8x32xbf16>
    %c4_55 = arith.constant 4 : index
    %c0_56 = arith.constant 0 : index
    %c0_57 = arith.constant 0 : index
    %95 = vector.load %arg6[%c4_55, %c0_56, %c0_57] : memref<9x32x128xbf16, #tpu.memory_space<vmem>>, vector<1x32x128xbf16>
    %96 = vector.shape_cast %95 : vector<1x32x128xbf16> to vector<32x128xbf16>
    %cst_58 = arith.constant dense<0.000000e+00> : vector<8x128xf32>
    %97 = tpu.matmul %94, %96, %cst_58 {dimension_numbers = #tpu.dot_dimension_numbers<[1], [0], [0], [1], [0, 0, 1, 1], [], []>} : vector<8x32xbf16>, vector<32x128xbf16>, vector<8x128xf32> -> vector<8x128xf32>
    %98 = arith.addf %92, %97 : vector<8x128xf32>
    %99 = vector.extract_strided_slice %67 {offsets = [40, 0], sizes = [8, 32], strides = [1, 1]} : vector<72x32xf32> to vector<8x32xf32>
    %100 = arith.truncf %99 : vector<8x32xf32> to vector<8x32xbf16>
    %c5_59 = arith.constant 5 : index
    %c0_60 = arith.constant 0 : index
    %c0_61 = arith.constant 0 : index
    %101 = vector.load %arg6[%c5_59, %c0_60, %c0_61] : memref<9x32x128xbf16, #tpu.memory_space<vmem>>, vector<1x32x128xbf16>
    %102 = vector.shape_cast %101 : vector<1x32x128xbf16> to vector<32x128xbf16>
    %cst_62 = arith.constant dense<0.000000e+00> : vector<8x128xf32>
    %103 = tpu.matmul %100, %102, %cst_62 {dimension_numbers = #tpu.dot_dimension_numbers<[1], [0], [0], [1], [0, 0, 1, 1], [], []>} : vector<8x32xbf16>, vector<32x128xbf16>, vector<8x128xf32> -> vector<8x128xf32>
    %104 = arith.addf %98, %103 : vector<8x128xf32>
    %105 = vector.extract_strided_slice %67 {offsets = [48, 0], sizes = [8, 32], strides = [1, 1]} : vector<72x32xf32> to vector<8x32xf32>
    %106 = arith.truncf %105 : vector<8x32xf32> to vector<8x32xbf16>
    %c6_63 = arith.constant 6 : index
    %c0_64 = arith.constant 0 : index
    %c0_65 = arith.constant 0 : index
    %107 = vector.load %arg6[%c6_63, %c0_64, %c0_65] : memref<9x32x128xbf16, #tpu.memory_space<vmem>>, vector<1x32x128xbf16>
    %108 = vector.shape_cast %107 : vector<1x32x128xbf16> to vector<32x128xbf16>
    %cst_66 = arith.constant dense<0.000000e+00> : vector<8x128xf32>
    %109 = tpu.matmul %106, %108, %cst_66 {dimension_numbers = #tpu.dot_dimension_numbers<[1], [0], [0], [1], [0, 0, 1, 1], [], []>} : vector<8x32xbf16>, vector<32x128xbf16>, vector<8x128xf32> -> vector<8x128xf32>
    %110 = arith.addf %104, %109 : vector<8x128xf32>
    %111 = vector.extract_strided_slice %67 {offsets = [56, 0], sizes = [8, 32], strides = [1, 1]} : vector<72x32xf32> to vector<8x32xf32>
    %112 = arith.truncf %111 : vector<8x32xf32> to vector<8x32xbf16>
    %c7_67 = arith.constant 7 : index
    %c0_68 = arith.constant 0 : index
    %c0_69 = arith.constant 0 : index
    %113 = vector.load %arg6[%c7_67, %c0_68, %c0_69] : memref<9x32x128xbf16, #tpu.memory_space<vmem>>, vector<1x32x128xbf16>
    %114 = vector.shape_cast %113 : vector<1x32x128xbf16> to vector<32x128xbf16>
    %cst_70 = arith.constant dense<0.000000e+00> : vector<8x128xf32>
    %115 = tpu.matmul %112, %114, %cst_70 {dimension_numbers = #tpu.dot_dimension_numbers<[1], [0], [0], [1], [0, 0, 1, 1], [], []>} : vector<8x32xbf16>, vector<32x128xbf16>, vector<8x128xf32> -> vector<8x128xf32>
    %116 = arith.addf %110, %115 : vector<8x128xf32>
    %117 = vector.extract_strided_slice %67 {offsets = [64, 0], sizes = [8, 32], strides = [1, 1]} : vector<72x32xf32> to vector<8x32xf32>
    %118 = arith.truncf %117 : vector<8x32xf32> to vector<8x32xbf16>
    %c8_71 = arith.constant 8 : index
    %c0_72 = arith.constant 0 : index
    %c0_73 = arith.constant 0 : index
    %119 = vector.load %arg6[%c8_71, %c0_72, %c0_73] : memref<9x32x128xbf16, #tpu.memory_space<vmem>>, vector<1x32x128xbf16>
    %120 = vector.shape_cast %119 : vector<1x32x128xbf16> to vector<32x128xbf16>
    %cst_74 = arith.constant dense<0.000000e+00> : vector<8x128xf32>
    %121 = tpu.matmul %118, %120, %cst_74 {dimension_numbers = #tpu.dot_dimension_numbers<[1], [0], [0], [1], [0, 0, 1, 1], [], []>} : vector<8x32xbf16>, vector<32x128xbf16>, vector<8x128xf32> -> vector<8x128xf32>
    %122 = arith.addf %116, %121 : vector<8x128xf32>
    %c0_75 = arith.constant 0 : index
    %c0_76 = arith.constant 0 : index
    %123 = vector.load %arg7[%c0_75, %c0_76] : memref<1x128xf32, #tpu.memory_space<vmem>>, vector<1x128xf32>
    %124 = vector.broadcast %123 : vector<1x128xf32> to vector<8x128xf32>
    %125 = arith.addf %122, %124 : vector<8x128xf32>
    %126 = tpu.iota {dimensions = array<i32: 1>} : vector<8x128xi32>
    %c50_i32 = arith.constant 50 : i32
    %127 = vector.broadcast %c50_i32 : i32 to vector<8x128xi32>
    %128 = arith.cmpi slt, %126, %127 : vector<8x128xi32>
    %cst_77 = arith.constant dense<0.000000e+00> : vector<8xf32>
    %129 = vector.multi_reduction <add>, %125, %cst_77 [1] : vector<8x128xf32> to vector<8xf32>
    %130 = vector.shape_cast %129 : vector<8xf32> to vector<8x1xf32>
    %cst_78 = arith.constant 5.000000e+01 : f32
    %131 = vector.broadcast %cst_78 : f32 to vector<8x1xf32>
    %132 = arith.divf %130, %131 : vector<8x1xf32>
    %133 = vector.broadcast %132 : vector<8x1xf32> to vector<8x128xf32>
    %134 = arith.subf %125, %133 : vector<8x128xf32>
    %cst_79 = arith.constant 0.000000e+00 : f32
    %135 = vector.broadcast %cst_79 : f32 to vector<8x128xf32>
    %136 = arith.select %128, %134, %135 : vector<8x128xi1>, vector<8x128xf32>
    %137 = arith.mulf %136, %136 : vector<8x128xf32>
    %cst_80 = arith.constant dense<0.000000e+00> : vector<8xf32>
    %138 = vector.multi_reduction <add>, %137, %cst_80 [1] : vector<8x128xf32> to vector<8xf32>
    %139 = vector.shape_cast %138 : vector<8xf32> to vector<8x1xf32>
    %cst_81 = arith.constant 5.000000e+01 : f32
    %140 = vector.broadcast %cst_81 : f32 to vector<8x1xf32>
    %141 = arith.divf %139, %140 : vector<8x1xf32>
    %cst_82 = arith.constant 9.99999974E-6 : f32
    %142 = vector.broadcast %cst_82 : f32 to vector<8x1xf32>
    %143 = arith.addf %141, %142 : vector<8x1xf32>
    %144 = math.rsqrt %143 : vector<8x1xf32>
    %145 = vector.broadcast %144 : vector<8x1xf32> to vector<8x128xf32>
    %146 = arith.mulf %136, %145 : vector<8x128xf32>
    %c0_83 = arith.constant 0 : index
    %c0_84 = arith.constant 0 : index
    %147 = vector.load %arg8[%c0_83, %c0_84] : memref<1x128xf32, #tpu.memory_space<vmem>>, vector<1x128xf32>
    %148 = vector.broadcast %147 : vector<1x128xf32> to vector<8x128xf32>
    %149 = arith.mulf %146, %148 : vector<8x128xf32>
    %c0_85 = arith.constant 0 : index
    %c0_86 = arith.constant 0 : index
    %150 = vector.load %arg9[%c0_85, %c0_86] : memref<1x128xf32, #tpu.memory_space<vmem>>, vector<1x128xf32>
    %151 = vector.broadcast %150 : vector<1x128xf32> to vector<8x128xf32>
    %152 = arith.addf %149, %151 : vector<8x128xf32>
    %153 = math.tanh %152 : vector<8x128xf32>
    %c0_87 = arith.constant 0 : index
    %c0_88 = arith.constant 0 : index
    %154 = vector.load %arg10[%c0_87, %c0_88] : memref<8x128xf32, #tpu.memory_space<vmem>>, vector<8x128xf32>
    tpu.vector_store %arg10[%c0_87, %c0_88], %153 {strides = array<i32>} : memref<8x128xf32, #tpu.memory_space<vmem>>, vector<8x128xf32>,
    return
  }
  func.func @transform_0(%arg0: i32) -> (i32, i32) {
    %c0_i32 = arith.constant 0 : i32
    %c0_i32_0 = arith.constant 0 : i32
    %c0_i32_1 = arith.constant 0 : i32
    return %c0_i32, %c0_i32_0 : i32, i32
  }
  func.func @transform_1(%arg0: i32) -> (i32, i32) {
    %c0_i32 = arith.constant 0 : i32
    %c0_i32_0 = arith.constant 0 : i32
    %c0_i32_1 = arith.constant 0 : i32
    return %c0_i32, %c0_i32_0 : i32, i32
  }
  func.func @transform_2(%arg0: i32) -> (i32, i32) {
    %c0_i32 = arith.constant 0 : i32
    %c0_i32_0 = arith.constant 0 : i32
    %c0_i32_1 = arith.constant 0 : i32
    return %c0_i32, %c0_i32_0 : i32, i32
  }
  func.func @transform_3(%arg0: i32) -> (i32, i32, i32) {
    %c0_i32 = arith.constant 0 : i32
    %c0_i32_0 = arith.constant 0 : i32
    %c0_i32_1 = arith.constant 0 : i32
    %c0_i32_2 = arith.constant 0 : i32
    return %c0_i32, %c0_i32_0, %c0_i32_1 : i32, i32, i32
  }
  func.func @transform_4(%arg0: i32) -> (i32, i32) {
    %c0_i32 = arith.constant 0 : i32
    %c0_i32_0 = arith.constant 0 : i32
    %c0_i32_1 = arith.constant 0 : i32
    return %c0_i32, %c0_i32_0 : i32, i32
  }
  func.func @transform_5(%arg0: i32) -> (i32, i32, i32) {
    %c0_i32 = arith.constant 0 : i32
    %c0_i32_0 = arith.constant 0 : i32
    %c0_i32_1 = arith.constant 0 : i32
    %c0_i32_2 = arith.constant 0 : i32
    return %c0_i32, %c0_i32_0, %c0_i32_1 : i32, i32, i32
  }
  func.func @transform_6(%arg0: i32) -> (i32, i32) {
    %c0_i32 = arith.constant 0 : i32
    %c0_i32_0 = arith.constant 0 : i32
    %c0_i32_1 = arith.constant 0 : i32
    return %c0_i32, %c0_i32_0 : i32, i32
  }
  func.func @transform_7(%arg0: i32) -> (i32, i32) {
    %c0_i32 = arith.constant 0 : i32
    %c0_i32_0 = arith.constant 0 : i32
    %c0_i32_1 = arith.constant 0 : i32
    return %c0_i32, %c0_i32_0 : i32, i32
  }
  func.func @transform_8(%arg0: i32) -> (i32, i32) {
    %c0_i32 = arith.constant 0 : i32
    %c0_i32_0 = arith.constant 0 : i32
    %c0_i32_1 = arith.constant 0 : i32
    return %c0_i32, %c0_i32_0 : i32, i32
  }
  func.func @transform_9(%arg0: i32) -> (i32, i32) {
    %c0_i32 = arith.constant 0 : i32
    %c0_i32_0 = arith.constant 0 : i32
    %c0_i32_1 = arith.constant 0 : i32
    return %c0_i32, %c0_i32_0 : i32, i32
  }
}

</mosaic_0001>

<bundles_post_ra>
// kernel: _lambda_.1
= control target key start
LH: loop header
LB: loop body
LE: loop exit
PB: predicated region body
PF: predicated region fallthrough
CT: control target
= control target key end

     0   :  { %vm465_vm0 = vcmask 1041408   ;;  %vm341_vm1 = vcmask 293888   ;;  %vm794_vm2 = vcmask 261120   ;;  %s3180_s1 = inlined_call_operand.vmem [shape: bf16[36,32], index: 1, kind: input, shape index: {}]   ;;  %s3181_s2 = inlined_call_operand.vmem [shape: f32[1,32], index: 2, kind: input, shape index: {}]   ;;  %s3182_s0 = inlined_call_operand.vmem [shape: bf16[648,36], index: 0, kind: input, shape index: {}]   ;;  %s3183_s3 = inlined_call_operand.vmem [shape: bf16[9,32,32], index: 3, kind: input, shape index: {}]   ;;  %s3184_s4 = inlined_call_operand.vmem [shape: f32[1,32], index: 4, kind: input, shape index: {}]   ;;  %s3185_s5 = inlined_call_operand.vmem [shape: bf16[9,32,128], index: 5, kind: input, shape index: {}]   ;;  %s3186_s6 = inlined_call_operand.vmem [shape: f32[1,128], index: 6, kind: input, shape index: {}]   ;;  %s3187_s7 = inlined_call_operand.vmem [shape: f32[1,128], index: 7, kind: input, shape index: {}]   ;;  %s3188_s8 = inlined_call_operand.vmem [shape: f32[1,128], index: 8, kind: input, shape index: {}]   ;;  %s3189_s9 = inlined_call_operand.vmem [shape: f32[8,128], index: 9, kind: output, shape index: {}]  }
   0x1   :  { %v118_v0 = vld [vmem:[%s3180_s1 + $0x10] sm:$0x3]  ;;  %v2354_v4 = vld [vmem:[%s3180_s1 + $0x8] sm:$0xff]  ;;  %v2353_v5 = vld [vmem:[%s3180_s1] sm:$0xff] }
   0x2   :  { %v335_v1 = vunpack.c.l.b16 %v118_v0  ;;  %v2313_v6 = vld [vmem:[%s3182_s0] sm:$0xff]  ;;  %v2343_v7 = vld [vmem:[%s3182_s0 + $0xf0] sm:$0xff]  ;;  %v2314_v8 = vld [vmem:[%s3182_s0 + $0x8] sm:$0xff] }
   0x3   :  { %v2344_v9 = vld [vmem:[%s3182_s0 + $0xf8] sm:$0xff]  ;;  %v2315_v10 = vld [vmem:[%s3182_s0 + $0x10] sm:$0xff]  ;;  %v2345_v11 = vld [vmem:[%s3182_s0 + $0x100] sm:$0xff] }
   0x4   :  { %v338_v2 = vpack.c.b16 %v335_v1, %v335_v1  ;;  %v2316_v12 = vld [vmem:[%s3182_s0 + $0x18] sm:$0xff]  ;;  %v2346_v13 = vld [vmem:[%s3182_s0 + $0x108] sm:$0xff]  ;;  %v2317_v14 = vld [vmem:[%s3182_s0 + $0x20] sm:$0xff] }
   0x5   :  { %v2347_v15 = vld [vmem:[%s3182_s0 + $0x110] sm:$0xff]  ;;  %v2318_v16 = vld [vmem:[%s3182_s0 + $0x28] sm:$0xff]  ;;  %v2337_v17 = vld [vmem:[%s3182_s0 + $0xc0] sm:$0xff] }
   0x6   :  { %v467_v3 = vsel %vm465_vm0, %v338_v2, 0  ;;  %v2348_v18 = vld [vmem:[%s3182_s0 + $0x118] sm:$0xff]  ;;  %v2319_v19 = vld [vmem:[%s3182_s0 + $0x30] sm:$0xff]  ;;  %v2338_v20 = vld [vmem:[%s3182_s0 + $0xc8] sm:$0xff] }
   0x7   :  { %474 = vmatpush.bf16.msra.mxu0 %v467_v3  ;;  %2392 = vmatpush.bf16.msra.mxu2 %v467_v3  ;;  %v2356_v21 = vld [vmem:[%s3183_s3 + $0x8] sm:$0xff]  ;;  %v2355_v22 = vld [vmem:[%s3183_s3] sm:$0xff]  ;;  %v2320_v23 = vld [vmem:[%s3182_s0 + $0x38] sm:$0xff] }
   0x8   :  { %2391 = vmatpush.bf16.msra.mxu1 %v467_v3  ;;  %2393 = vmatpush.bf16.msra.mxu3 %v467_v3  ;;  %v2339_v24 = vld [vmem:[%s3182_s0 + $0xd0] sm:$0xff]  ;;  %v2321_v25 = vld [vmem:[%s3182_s0 + $0x40] sm:$0xff]  ;;  %v2340_v28 = vld [vmem:[%s3182_s0 + $0xd8] sm:$0xff] }
   0x9   :  { %v2552_v27 = vld [vmem:[%s3181_s2] ss:$0 sm:$0xff]  ;;  %v2322_v35 = vld [vmem:[%s3182_s0 + $0x48] sm:$0xff]  ;;  %v2323_v45 = vld [vmem:[%s3182_s0 + $0x50] sm:$0xff] }
   0xa   :  { %v2341_v37 = vld [vmem:[%s3182_s0 + $0xe0] sm:$0xff]  ;;  %v2342_v48 = vld [vmem:[%s3182_s0 + $0xe8] sm:$0xff]  ;;  %v2358_v57 = vld [vmem:[%s3183_s3 + $0x18] sm:$0xff] }
   0xb   :  { %475 = vmatpush.bf16.msra.mxu0 %v2354_v4  ;;  %2395 = vmatpush.bf16.msra.mxu2 %v2354_v4  ;;  %v2349_v54 = vld [vmem:[%s3182_s0 + $0x120] sm:$0xff]  ;;  %v2324_v58 = vld [vmem:[%s3182_s0 + $0x58] sm:$0xff]  ;;  %v2357_v60 = vld [vmem:[%s3183_s3 + $0x10] sm:$0xff] }
   0xc   :  { %2394 = vmatpush.bf16.msra.mxu1 %v2354_v4  ;;  %2396 = vmatpush.bf16.msra.mxu3 %v2354_v4  ;;  %v2350_v3 = vld [vmem:[%s3182_s0 + $0x128] sm:$0xff] }
   0xf   :  { %476 = vmatpush.bf16.msra.mxu0 %v2353_v5  ;;  %2398 = vmatpush.bf16.msra.mxu2 %v2353_v5 }
  0x10   :  { %2397 = vmatpush.bf16.msra.mxu1 %v2353_v5  ;;  %2399 = vmatpush.bf16.msra.mxu3 %v2353_v5  ;;  %v2325_v5 = vld [vmem:[%s3182_s0 + $0x60] sm:$0xff] }
  0x12   :  { %2010 = vmatmul.msk.bf16.vlgmr.msra.gmra.mxu0 %vm341_vm1, %v2313_v6  ;;  %2040 = vmatmul.msk.bf16.vlgmr.msra.gmra.mxu2 %vm341_vm1, %v2343_v7 }
  0x13   :  { %2034 = vmatmul.msk.bf16.vlgmr.msra.gmra.mxu1 %vm341_vm1, %v2337_v17  ;;  %876 = vmatpush.bf16.msrb.mxu2 %v2356_v21 }
  0x14   :  { %2046 = vmatmul.msk.bf16.vlgmr.msra.gmra.mxu3 %vm341_vm1, %v2349_v54  ;;  %816 = vmatpush.bf16.msrb.mxu1 %v2358_v57  ;;  %v2359_v54 = vld [vmem:[%s3183_s3 + $0x20] sm:$0xff] }
  0x17   :  { %877 = vmatpush.bf16.msrb.mxu2 %v2355_v22 }
  0x18   :  { %817 = vmatpush.bf16.msrb.mxu1 %v2357_v60 }
  0x22   :  { %2011 = vmatmul.msk.bf16.gmra.mxu0 %vm341_vm1, %v2314_v8  ;;  %2041 = vmatmul.msk.bf16.gmra.mxu2 %vm341_vm1, %v2344_v9 }
  0x23   :  { %2035 = vmatmul.msk.bf16.gmra.mxu1 %vm341_vm1, %v2338_v20 }
  0x24   :  { %2047 = vmatmul.msk.bf16.gmra.mxu3 %vm341_vm1, %v2350_v3 }
  0x32   :  { %2012 = vmatmul.msk.bf16.gmra.mxu0 %vm341_vm1, %v2315_v10  ;;  %2042 = vmatmul.msk.bf16.gmra.mxu2 %vm341_vm1, %v2345_v11  ;;  %v2351_v11 = vld [vmem:[%s3182_s0 + $0x130] sm:$0xff] }
  0x33   :  { %2036 = vmatmul.msk.bf16.gmra.mxu1 %vm341_vm1, %v2339_v24  ;;  %v2352_v24 = vld [vmem:[%s3182_s0 + $0x138] sm:$0xff] }
  0x34   :  { %2048 = vmatmul.msk.bf16.gmra.mxu3 %vm341_vm1, %v2351_v11 }
  0x42   :  { %2013 = vmatmul.msk.bf16.gmra.mxu0 %vm341_vm1, %v2316_v12  ;;  %2043 = vmatmul.msk.bf16.gmra.mxu2 %vm341_vm1, %v2346_v13 }
  0x43   :  { %2037 = vmatmul.msk.bf16.gmra.mxu1 %vm341_vm1, %v2340_v28 }
  0x44   :  { %2049 = vmatmul.msk.bf16.gmra.mxu3 %vm341_vm1, %v2352_v24 }
  0x52   :  { %2014 = vmatmul.msk.bf16.gmra.mxu0 %vm341_vm1, %v2317_v14  ;;  %2044 = vmatmul.msk.bf16.gmra.mxu2 %vm341_vm1, %v2347_v15  ;;  %v2326_v15 = vld [vmem:[%s3182_s0 + $0x68] sm:$0xff] }
  0x53   :  { %2038 = vmatmul.msk.bf16.gmra.mxu1 %vm341_vm1, %v2341_v37  ;;  %v113_v37 = vld [vmem:[%s3182_s0 + $0x140] sm:$0xf] }
  0x62   :  { %2015 = vmatmul.msk.bf16.gmra.mxu0 %vm341_vm1, %v2318_v16  ;;  %2045 = vmatmul.msk.bf16.gmra.mxu2 %vm341_vm1, %v2348_v18 }
  0x63   :  { %2039 = vmatmul.msk.bf16.gmra.mxu1 %vm341_vm1, %v2342_v48 }
  0x72   :  { %2016 = vmatmul.msk.bf16.gmra.mxu0 %vm341_vm1, %v2319_v19 }
  0x82   :  { %2017 = vmatmul.msk.bf16.gmra.mxu0 %vm341_vm1, %v2320_v23 }
  0x8f   :  { %v478_v26 = vpop.f32.mrf.mxu0 }
  0x90   :  { %v479_v29 = vadd.f32 %v2552_v27, %v478_v26  ;;  %v2636_v23 = vpop.f32.mrf.mxu1  ;;  %v2327_v26 = vld [vmem:[%s3182_s0 + $0x70] sm:$0xff] }
  0x92   :  { %2018 = vmatmul.msk.bf16.gmra.mxu0 %vm341_vm1, %v2321_v25  ;;  %v682_v32 = vmax.f32 %v479_v29, 0.0 }
  0x95   :  { %v2572_v41 = vpop.f32.mrf.mxu2 }
  0x97   :  { %v480_v30 = vpop.f32.mrf.mxu0 }
  0x98   :  { %v481_v31 = vadd.f32 %v2552_v27, %v480_v30 }
  0x9a   :  { %v683_v33 = vmax.f32 %v481_v31, 0.0 }
  0x9c   :  { %v763_v34 = vpack.c.bf16 %v683_v33, %v682_v32 }
  0x9d   :  { %v2579_v47 = vpop.f32.mrf.mxu2 }
  0x9e   :  { %2076 = vmatmul.msk.bf16.vlgmr.msrb.gmra.mxu2 %vm794_vm2, %v763_v34  ;;  %v2650_v34 = vpop.f32.mrf.mxu1 }
  0x9f   :  { %v483_v36 = vpop.f32.mrf.mxu0 }
  0xa0   :  { %v484_v38 = vadd.f32 %v2552_v27, %v483_v36 }
  0xa2   :  { %2019 = vmatmul.msk.bf16.gmra.mxu0 %vm341_vm1, %v2322_v35  ;;  %v684_v42 = vmax.f32 %v484_v38, 0.0  ;;  %v284_v38 = vunpack.c.l.b16 %v113_v37 }
  0xa5   :  { %v2591_v56 = vpop.f32.mrf.mxu2 }
  0xa7   :  { %v485_v39 = vpop.f32.mrf.mxu0 }
  0xa8   :  { %v486_v40 = vadd.f32 %v2552_v27, %v485_v39  ;;  %v325_v39 = vpack.c.b16 %v284_v38, %v284_v38 }
  0xaa   :  { %v685_v43 = vmax.f32 %v486_v40, 0.0  ;;  %2050 = vmatmul.msk.bf16.gmra.mxu3 %vm341_vm1, %v325_v39  ;;  %v2332_v39 = vld [vmem:[%s3182_s0 + $0x98] sm:$0xff] }
  0xac   :  { %v764_v44 = vpack.c.bf16 %v685_v43, %v684_v42  ;;  %v2328_v42 = vld [vmem:[%s3182_s0 + $0x78] sm:$0xff]  ;;  %v2662_v43 = vpop.f32.mrf.mxu1 }
  0xad   :  { %v2605_v63 = vpop.f32.mrf.mxu2 }
  0xae   :  { %2077 = vmatmul.msk.bf16.gmra.mxu2 %vm794_vm2, %v764_v44 }
  0xaf   :  { %v488_v46 = vpop.f32.mrf.mxu0 }
  0xb0   :  { %v489_v49 = vadd.f32 %v2552_v27, %v488_v46 }
  0xb2   :  { %2020 = vmatmul.msk.bf16.gmra.mxu0 %vm341_vm1, %v2323_v45  ;;  %v686_v52 = vmax.f32 %v489_v49, 0.0 }
  0xb5   :  { %v2616_v7 = vpop.f32.mrf.mxu2 }
  0xb7   :  { %v490_v50 = vpop.f32.mrf.mxu0 }
  0xb8   :  { %v491_v51 = vadd.f32 %v2552_v27, %v490_v50 }
  0xba   :  { %v687_v53 = vmax.f32 %v491_v51, 0.0  ;;  %v2360_v51 = vld [vmem:[%s3183_s3 + $0x28] sm:$0xff] }
  0xbb   :  { %946 = vmatpush.bf16.msrb.mxu3 %v2360_v51 }
  0xbc   :  { %v765_v55 = vpack.c.bf16 %v687_v53, %v686_v52  ;;  %v2673_v53 = vpop.f32.mrf.mxu1 }
  0xbd   :  { %v2623_v12 = vpop.f32.mrf.mxu2 }
  0xbe   :  { %2078 = vmatmul.msk.bf16.gmra.mxu2 %vm794_vm2, %v765_v55 }
  0xbf   :  { %v493_v59 = vpop.f32.mrf.mxu0  ;;  %947 = vmatpush.bf16.msrb.mxu3 %v2359_v54 }
  0xc0   :  { %v494_v61 = vadd.f32 %v2552_v27, %v493_v59 }
  0xc2   :  { %2021 = vmatmul.msk.bf16.gmra.mxu0 %vm341_vm1, %v2324_v58  ;;  %v688_v1 = vmax.f32 %v494_v61, 0.0  ;;  %v2329_v58 = vld [vmem:[%s3182_s0 + $0x80] sm:$0xff] }
  0xc5   :  { %v2633_v21 = vpop.f32.mrf.mxu2 }
  0xc7   :  { %v495_v62 = vpop.f32.mrf.mxu0 }
  0xc8   :  { %v496_v0 = vadd.f32 %v2552_v27, %v495_v62 }
  0xca   :  { %v689_v2 = vmax.f32 %v496_v0, 0.0  ;;  %v2686_v0 = vpop.f32.mrf.mxu1 }
  0xcc   :  { %v766_v4 = vpack.c.bf16 %v689_v2, %v688_v1 }
  0xcd   :  { %v2646_v29 = vpop.f32.mrf.mxu2 }
  0xce   :  { %2079 = vmatmul.msk.bf16.gmra.mxu2 %vm794_vm2, %v766_v4 }
  0xcf   :  { %v498_v6 = vpop.f32.mrf.mxu0 }
  0xd0   :  { %v499_v8 = vadd.f32 %v2552_v27, %v498_v6  ;;  %v2330_v6 = vld [vmem:[%s3182_s0 + $0x88] sm:$0xff] }
  0xd2   :  { %2022 = vmatmul.msk.bf16.gmra.mxu0 %vm341_vm1, %v2325_v5  ;;  %v690_v10 = vmax.f32 %v499_v8, 0.0  ;;  %v2692_v5 = vpop.f32.mrf.mxu1 }
  0xd4   :  { %v767_v13 = vpack.c.bf16 %v690_v10, %v690_v10 }
  0xd5   :  { %v2653_v36 = vpop.f32.mrf.mxu2 }
  0xd7   :  { %v500_v9 = vpop.f32.mrf.mxu0 }
  0xd8   :  { %v501_v14 = vadd.f32 %v2552_v27, %v500_v9 }
  0xda   :  { %v691_v18 = vmax.f32 %v501_v14, 0.0  ;;  %v2702_v14 = vpop.f32.mrf.mxu1 }
  0xdd   :  { %v2667_v49 = vpop.f32.mrf.mxu2 }
  0xde   :  { %2080 = vmatmul.msk.bf16.gmra.mxu2 %vm794_vm2, %v767_v13 }
  0xdf   :  { %v503_v16 = vpop.f32.mrf.mxu0 }
  0xe0   :  { %v504_v17 = vadd.f32 %v2552_v27, %v503_v16 }
  0xe2   :  { %v692_v19 = vmax.f32 %v504_v17, 0.0  ;;  %2023 = vmatmul.msk.bf16.gmra.mxu0 %vm341_vm1, %v2326_v15 }
  0xe4   :  { %v772_v20 = vpack.c.bf16 %v692_v19, %v691_v18 }
  0xe5   :  { %v2678_v55 = vpop.f32.mrf.mxu2 }
  0xe6   :  { %2063 = vmatmul.msk.bf16.vlgmr.msrb.gmra.mxu1 %vm794_vm2, %v772_v20 }
  0xe7   :  { %v505_v22 = vpop.f32.mrf.mxu0 }
  0xe8   :  { %v506_v25 = vadd.f32 %v2552_v27, %v505_v22  ;;  %v2331_v22 = vld [vmem:[%s3182_s0 + $0x90] sm:$0xff] }
  0xea   :  { %v693_v31 = vmax.f32 %v506_v25, 0.0  ;;  %v2711_v25 = vpop.f32.mrf.mxu1 }
  0xed   :  { %v2689_v3 = vpop.f32.mrf.mxu2 }
  0xef   :  { %v508_v28 = vpop.f32.mrf.mxu0 }
  0xf0   :  { %v509_v30 = vadd.f32 %v2552_v27, %v508_v28 }
  0xf2   :  { %v694_v32 = vmax.f32 %v509_v30, 0.0  ;;  %2024 = vmatmul.msk.bf16.gmra.mxu0 %vm341_vm1, %v2327_v26  ;;  %v2720_v37 = vpop.f32.mrf.mxu1 }
  0xf4   :  { %v773_v33 = vpack.c.bf16 %v694_v32, %v693_v31 }
  0xf6   :  { %2064 = vmatmul.msk.bf16.gmra.mxu1 %vm794_vm2, %v773_v33 }
  0xf7   :  { %v510_v35 = vpop.f32.mrf.mxu0 }
  0xf8   :  { %v511_v40 = vadd.f32 %v2552_v27, %v510_v35 }
  0xfa   :  { %v695_v46 = vmax.f32 %v511_v40, 0.0 }
  0xff   :  { %v513_v44 = vpop.f32.mrf.mxu0 }
 0x100   :  { %v514_v45 = vadd.f32 %v2552_v27, %v513_v44  ;;  %v2728_v44 = vpop.f32.mrf.mxu3 }
 0x102   :  { %v696_v48 = vmax.f32 %v514_v45, 0.0  ;;  %2025 = vmatmul.msk.bf16.gmra.mxu0 %vm341_vm1, %v2328_v42  ;;  %v2731_v45 = vpop.f32.mrf.mxu1 }
 0x104   :  { %v774_v50 = vpack.c.bf16 %v696_v48, %v695_v46 }
 0x106   :  { %2065 = vmatmul.msk.bf16.gmra.mxu1 %vm794_vm2, %v774_v50 }
 0x107   :  { %v515_v52 = vpop.f32.mrf.mxu0 }
 0x108   :  { %v516_v57 = vadd.f32 %v2552_v27, %v515_v52  ;;  %v2737_v52 = vpop.f32.mrf.mxu3 }
 0x10a   :  { %v697_v61 = vmax.f32 %v516_v57, 0.0 }
 0x10f   :  { %v518_v59 = vpop.f32.mrf.mxu0 }
 0x110   :  { %v519_v60 = vadd.f32 %v2552_v27, %v518_v59  ;;  %v2362_v59 = vld [vmem:[%s3183_s3 + $0x38] sm:$0xff] }
 0x111   :  { %1025 = vmatpush.bf16.msra.mxu1 %v2362_v59 }
 0x112   :  { %v698_v62 = vmax.f32 %v519_v60, 0.0  ;;  %2026 = vmatmul.msk.bf16.gmra.mxu0 %vm341_vm1, %v2329_v58  ;;  %v2333_v60 = vld [vmem:[%s3182_s0 + $0xa0] sm:$0xff] }
 0x114   :  { %v775_v1 = vpack.c.bf16 %v698_v62, %v697_v61  ;;  %v2746_v61 = vpop.f32.mrf.mxu1 }
 0x116   :  { %2066 = vmatmul.msk.bf16.gmra.mxu1 %vm794_vm2, %v775_v1 }
 0x117   :  { %v520_v2 = vpop.f32.mrf.mxu0 }
 0x118   :  { %v521_v4 = vadd.f32 %v2552_v27, %v520_v2  ;;  %v2750_v2 = vpop.f32.mrf.mxu3 }
 0x11a   :  { %v699_v9 = vmax.f32 %v521_v4, 0.0  ;;  %v2361_v4 = vld [vmem:[%s3183_s3 + $0x30] sm:$0xff] }
 0x11b   :  { %1026 = vmatpush.bf16.msra.mxu1 %v2361_v4 }
 0x11c   :  { %v776_v11 = vpack.c.bf16 %v699_v9, %v699_v9 }
 0x11f   :  { %v523_v8 = vpop.f32.mrf.mxu0 }
 0x120   :  { %v524_v13 = vadd.f32 %v2552_v27, %v523_v8 }
 0x121   :  { %v2697_v10 = vpop.f32.mrf.mxu2 }
 0x122   :  { %2027 = vmatmul.msk.bf16.gmra.mxu0 %vm341_vm1, %v2330_v6  ;;  %v700_v18 = vmax.f32 %v524_v13, 0.0 }
 0x126   :  { %2067 = vmatmul.msk.bf16.gmra.mxu1 %vm794_vm2, %v776_v11  ;;  %v2758_v11 = vpop.f32.mrf.mxu1 }
 0x127   :  { %v525_v15 = vpop.f32.mrf.mxu0 }
 0x128   :  { %v526_v16 = vadd.f32 %v2552_v27, %v525_v15  ;;  %v2762_v15 = vpop.f32.mrf.mxu3 }
 0x129   :  { %v2705_v17 = vpop.f32.mrf.mxu2 }
 0x12a   :  { %v701_v19 = vmax.f32 %v526_v16, 0.0 }
 0x12c   :  { %v903_v20 = vpack.c.bf16 %v701_v19, %v700_v18 }
 0x12e   :  { %2093 = vmatmul.msk.bf16.vlgmr.msrb.gmra.mxu3 %vm794_vm2, %v903_v20  ;;  %v2334_v20 = vld [vmem:[%s3182_s0 + $0xa8] sm:$0xff] }
 0x12f   :  { %v528_v24 = vpop.f32.mrf.mxu0 }
 0x130   :  { %v529_v28 = vadd.f32 %v2552_v27, %v528_v24 }
 0x131   :  { %v2713_v26 = vpop.f32.mrf.mxu2 }
 0x132   :  { %2028 = vmatmul.msk.bf16.gmra.mxu0 %vm341_vm1, %v2331_v22  ;;  %v702_v33 = vmax.f32 %v529_v28, 0.0  ;;  %v2770_v28 = vpop.f32.mrf.mxu3 }
 0x137   :  { %v530_v30 = vpop.f32.mrf.mxu0 }
 0x138   :  { %v531_v31 = vadd.f32 %v2552_v27, %v530_v30 }
 0x139   :  { %v2718_v32 = vpop.f32.mrf.mxu2 }
 0x13a   :  { %v703_v35 = vmax.f32 %v531_v31, 0.0 }
 0x13c   :  { %v904_v38 = vpack.c.bf16 %v703_v35, %v702_v33 }
 0x13e   :  { %2094 = vmatmul.msk.bf16.gmra.mxu3 %vm794_vm2, %v904_v38 }
 0x13f   :  { %v533_v40 = vpop.f32.mrf.mxu0 }
 0x140   :  { %v534_v46 = vadd.f32 %v2552_v27, %v533_v40  ;;  %v2777_v40 = vpop.f32.mrf.mxu3 }
 0x141   :  { %v2726_v42 = vpop.f32.mrf.mxu2 }
 0x142   :  { %2029 = vmatmul.msk.bf16.gmra.mxu0 %vm341_vm1, %v2332_v39  ;;  %v704_v54 = vmax.f32 %v534_v46, 0.0 }
 0x147   :  { %v535_v48 = vpop.f32.mrf.mxu0 }
 0x148   :  { %v536_v50 = vadd.f32 %v2552_v27, %v535_v48 }
 0x149   :  { %v2735_v51 = vpop.f32.mrf.mxu2 }
 0x14a   :  { %v705_v57 = vmax.f32 %v536_v50, 0.0 }
 0x14c   :  { %v905_v58 = vpack.c.bf16 %v705_v57, %v704_v54  ;;  %v2335_v54 = vld [vmem:[%s3182_s0 + $0xb0] sm:$0xff] }
 0x14e   :  { %2095 = vmatmul.msk.bf16.gmra.mxu3 %vm794_vm2, %v905_v58  ;;  %v2787_v58 = vpop.f32.mrf.mxu3 }
 0x14f   :  { %v538_v62 = vpop.f32.mrf.mxu0 }
 0x150   :  { %v539_v6 = vadd.f32 %v2552_v27, %v538_v62 }
 0x151   :  { %v2748_v1 = vpop.f32.mrf.mxu2 }
 0x152   :  { %2030 = vmatmul.msk.bf16.gmra.mxu0 %vm341_vm1, %v2333_v60  ;;  %v706_v16 = vmax.f32 %v539_v6, 0.0 }
 0x157   :  { %v540_v8 = vpop.f32.mrf.mxu0 }
 0x158   :  { %v541_v9 = vadd.f32 %v2552_v27, %v540_v8 }
 0x159   :  { %v2760_v13 = vpop.f32.mrf.mxu2 }
 0x15a   :  { %v707_v18 = vmax.f32 %v541_v9, 0.0  ;;  %v2794_v9 = vpop.f32.mrf.mxu3 }
 0x15c   :  { %v906_v19 = vpack.c.bf16 %v707_v18, %v706_v16 }
 0x15e   :  { %2096 = vmatmul.msk.bf16.gmra.mxu3 %vm794_vm2, %v906_v19  ;;  %v2336_v19 = vld [vmem:[%s3182_s0 + $0xb8] sm:$0xff] }
 0x15f   :  { %v543_v22 = vpop.f32.mrf.mxu0 }
 0x160   :  { %v544_v31 = vadd.f32 %v2552_v27, %v543_v22 }
 0x161   :  { %v2768_v24 = vpop.f32.mrf.mxu2 }
 0x162   :  { %2031 = vmatmul.msk.bf16.gmra.mxu0 %vm341_vm1, %v2334_v20  ;;  %v708_v38 = vmax.f32 %v544_v31, 0.0 }
 0x163   :  { %v819_v30 = vpop.f32.mrf.mxu1 }
 0x164   :  { %v2775_v33 = vadd.f32 %v2697_v10, %v819_v30  ;;  %v907_v48 = vpack.c.bf16 %v708_v38, %v708_v38  ;;  %v2803_v30 = vpop.f32.mrf.mxu3 }
 0x167   :  { %v545_v35 = vpop.f32.mrf.mxu0 }
 0x168   :  { %v546_v50 = vadd.f32 %v2552_v27, %v545_v35 }
 0x169   :  { %v901_v39 = vpop.f32.mrf.mxu2 }
 0x16a   :  { %v709_v59 = vmax.f32 %v546_v50, 0.0 }
 0x16b   :  { %v2779_v46 = vpop.f32.mrf.mxu1 }
 0x16c   :  { %v680_v50 = vpop.f32.mrf.mxu3 }
 0x16e   :  { %2097 = vmatmul.msk.bf16.gmra.mxu3 %vm794_vm2, %v907_v48 }
 0x16f   :  { %v548_v57 = vpop.f32.mrf.mxu0 }
 0x170   :  { %v549_v10 = vadd.f32 %v2552_v27, %v548_v57 }
 0x172   :  { %v710_v60 = vmax.f32 %v549_v10, 0.0  ;;  %2032 = vmatmul.msk.bf16.gmra.mxu0 %vm341_vm1, %v2335_v54 }
 0x173   :  { %v824_v62 = vpop.f32.mrf.mxu1 }
 0x174   :  { %v982_v4 = vpack.c.bf16 %v710_v60, %v709_v59  ;;  %v2791_v6 = vadd.f32 %v2713_v26, %v824_v62 }
 0x176   :  { %2110 = vmatmul.msk.bf16.vlgmr.msra.gmra.mxu1 %vm794_vm2, %v982_v4  ;;  %v2364_v4 = vld [vmem:[%s3183_s3 + $0x48] sm:$0xff] }
 0x177   :  { %v550_v8 = vpop.f32.mrf.mxu0  ;;  %1104 = vmatpush.bf16.msra.mxu2 %v2364_v4 }
 0x178   :  { %v551_v18 = vadd.f32 %v2552_v27, %v550_v8 }
 0x17a   :  { %v711_v26 = vmax.f32 %v551_v18, 0.0 }
 0x17b   :  { %v2796_v16 = vpop.f32.mrf.mxu1 }
 0x17f   :  { %v553_v20 = vpop.f32.mrf.mxu0 }
 0x180   :  { %v554_v22 = vadd.f32 %v2552_v27, %v553_v20 }
 0x182   :  { %v712_v31 = vmax.f32 %v554_v22, 0.0  ;;  %2033 = vmatmul.msk.bf16.gmra.mxu0 %vm341_vm1, %v2336_v19  ;;  %v2366_v19 = vld [vmem:[%s3183_s3 + $0x58] sm:$0xff]  ;;  %v2363_v22 = vld [vmem:[%s3183_s3 + $0x40] sm:$0xff] }
 0x183   :  { %v829_v35 = vpop.f32.mrf.mxu1  ;;  %1183 = vmatpush.bf16.msra.mxu3 %v2366_v19  ;;  %1105 = vmatpush.bf16.msra.mxu2 %v2363_v22 }
 0x184   :  { %v983_v38 = vpack.c.bf16 %v712_v31, %v711_v26  ;;  %v2807_v39 = vadd.f32 %v2726_v42, %v829_v35 }
 0x186   :  { %2111 = vmatmul.msk.bf16.gmra.mxu1 %vm794_vm2, %v983_v38 }
 0x187   :  { %v555_v48 = vpop.f32.mrf.mxu0 }
 0x188   :  { %v556_v57 = vadd.f32 %v2552_v27, %v555_v48  ;;  %v2367_v48 = vld [vmem:[%s3183_s3 + $0x60] sm:$0xff] }
 0x18a   :  { %v713_v60 = vmax.f32 %v556_v57, 0.0 }
 0x18b   :  { %v2810_v54 = vpop.f32.mrf.mxu1 }
 0x18f   :  { %v558_v10 = vpop.f32.mrf.mxu0 }
 0x190   :  { %v559_v59 = vadd.f32 %v2552_v27, %v558_v10 }
 0x192   :  { %v714_v62 = vmax.f32 %v559_v59, 0.0 }
 0x193   :  { %v834_v8 = vpop.f32.mrf.mxu1 }
 0x194   :  { %v984_v42 = vpack.c.bf16 %v714_v62, %v713_v60  ;;  %v2818_v18 = vadd.f32 %v2748_v1, %v834_v8  ;;  %v2368_v1 = vld [vmem:[%s3183_s3 + $0x68] sm:$0xff] }
 0x195   :  { %1262 = vmatpush.bf16.msrb.mxu1 %v2368_v1 }
 0x196   :  { %2112 = vmatmul.msk.bf16.gmra.mxu1 %vm794_vm2, %v984_v42 }
 0x197   :  { %v560_v20 = vpop.f32.mrf.mxu0 }
 0x198   :  { %v561_v31 = vadd.f32 %v2552_v27, %v560_v20 }
 0x199   :  { %1263 = vmatpush.bf16.msrb.mxu1 %v2367_v48  ;;  %v614_v48 = vadd.f32 %v2552_v27, %v2702_v14 }
 0x19a   :  { %v715_v50 = vmax.f32 %v561_v31, 0.0 }
 0x19b   :  { %v2827_v26 = vpop.f32.mrf.mxu1 }
 0x19f   :  { %v563_v35 = vpop.f32.mrf.mxu0 }
 0x1a0   :  { %v564_v38 = vadd.f32 %v2552_v27, %v563_v35 }
 0x1a2   :  { %v716_v57 = vmax.f32 %v564_v38, 0.0 }
 0x1a3   :  { %v839_v10 = vpop.f32.mrf.mxu1 }
 0x1a4   :  { %v985_v59 = vpack.c.bf16 %v716_v57, %v715_v50  ;;  %v2838_v60 = vadd.f32 %v2768_v24, %v839_v10  ;;  %v616_v50 = vadd.f32 %v2552_v27, %v2711_v25 }
 0x1a6   :  { %2113 = vmatmul.msk.bf16.gmra.mxu1 %vm794_vm2, %v985_v59  ;;  %v736_v59 = vmax.f32 %v614_v48, 0.0 }
 0x1a7   :  { %v565_v62 = vpop.f32.mrf.mxu0 }
 0x1a8   :  { %v566_v8 = vadd.f32 %v2552_v27, %v565_v62  ;;  %v737_v62 = vmax.f32 %v616_v50, 0.0 }
 0x1aa   :  { %v717_v19 = vmax.f32 %v566_v8, 0.0 }
 0x1ab   :  { %v841_v4 = vpop.f32.mrf.mxu1 }
 0x1ac   :  { %v986_v1 = vpack.c.bf16 %v717_v19, %v717_v19  ;;  %v2365_v4 = vld [vmem:[%s3183_s3 + $0x50] sm:$0xff]  ;;  %v1219_v19 = vpack.c.bf16 %v737_v62, %v736_v59 }
 0x1ad   :  { %1184 = vmatpush.bf16.msra.mxu3 %v2365_v4 }
 0x1af   :  { %v568_v42 = vpop.f32.mrf.mxu0 }
 0x1b0   :  { %v569_v31 = vadd.f32 %v2552_v27, %v568_v42 }
 0x1b1   :  { %v949_v20 = vpop.f32.mrf.mxu3 }
 0x1b2   :  { %v2843_v22 = vadd.f32 %v949_v20, %v2775_v33  ;;  %v718_v57 = vmax.f32 %v569_v31, 0.0 }
 0x1b6   :  { %2114 = vmatmul.msk.bf16.gmra.mxu1 %vm794_vm2, %v986_v1 }
 0x1b7   :  { %v570_v35 = vpop.f32.mrf.mxu0 }
 0x1b8   :  { %v571_v24 = vadd.f32 %v2552_v27, %v570_v35  ;;  %v619_v35 = vadd.f32 %v2552_v27, %v2720_v37 }
 0x1b9   :  { %v2848_v38 = vpop.f32.mrf.mxu3 }
 0x1ba   :  { %v719_v10 = vmax.f32 %v571_v24, 0.0  ;;  %v621_v24 = vadd.f32 %v2552_v27, %v2731_v45 }
 0x1bc   :  { %v1061_v33 = vpack.c.bf16 %v719_v10, %v718_v57  ;;  %v739_v10 = vmax.f32 %v621_v24, 0.0 }
 0x1be   :  { %2127 = vmatmul.msk.bf16.vlgmr.msra.gmra.mxu2 %vm794_vm2, %v1061_v33 }
 0x1bf   :  { %v573_v8 = vpop.f32.mrf.mxu0 }
 0x1c0   :  { %v574_v25 = vadd.f32 %v2552_v27, %v573_v8 }
 0x1c1   :  { %v954_v42 = vpop.f32.mrf.mxu3 }
 0x1c2   :  { %v2859_v14 = vadd.f32 %v954_v42, %v2791_v6  ;;  %v720_v48 = vmax.f32 %v574_v25, 0.0  ;;  %v738_v6 = vmax.f32 %v619_v35, 0.0  ;;  %v626_v25 = vadd.f32 %v2552_v27, %v2758_v11  ;;  %v2372_v11 = vld [vmem:[%s3183_s3 + $0x88] sm:$0xff] }
 0x1c3   :  { %1420 = vmatpush.bf16.msrb.mxu3 %v2372_v11  ;;  %v634_v11 = vadd.f32 %v2552_v27, %v2591_v56  ;;  %v639_v56 = vadd.f32 %v2552_v27, %v2616_v7  ;;  %v2371_v7 = vld [vmem:[%s3183_s3 + $0x80] sm:$0xff] }
 0x1c4   :  { %v1220_v62 = vpack.c.bf16 %v739_v10, %v738_v6  ;;  %v741_v24 = vmax.f32 %v626_v25, 0.0 }
 0x1c6   :  { %2161 = vmatmul.msk.bf16.vlgmr.msrb.gmra.mxu1 %vm794_vm2, %v1219_v19  ;;  %v624_v19 = vadd.f32 %v2552_v27, %v2746_v61  ;;  %v2370_v61 = vld [vmem:[%s3183_s3 + $0x78] sm:$0xff] }
 0x1c7   :  { %v575_v20 = vpop.f32.mrf.mxu0  ;;  %1341 = vmatpush.bf16.msrb.mxu2 %v2370_v61  ;;  %1421 = vmatpush.bf16.msrb.mxu3 %v2371_v7  ;;  %v654_v7 = vadd.f32 %v2552_v27, %v2678_v55 }
 0x1c8   :  { %v576_v1 = vadd.f32 %v2552_v27, %v575_v20 }
 0x1c9   :  { %v2864_v31 = vpop.f32.mrf.mxu3 }
 0x1ca   :  { %v721_v50 = vmax.f32 %v576_v1, 0.0 }
 0x1cc   :  { %v1062_v57 = vpack.c.bf16 %v721_v50, %v720_v48 }
 0x1ce   :  { %2128 = vmatmul.msk.bf16.gmra.mxu2 %vm794_vm2, %v1062_v57 }
 0x1cf   :  { %v578_v33 = vpop.f32.mrf.mxu0 }
 0x1d0   :  { %v579_v8 = vadd.f32 %v2552_v27, %v578_v33 }
 0x1d1   :  { %v959_v59 = vpop.f32.mrf.mxu3 }
 0x1d2   :  { %v2872_v4 = vadd.f32 %v959_v59, %v2807_v39  ;;  %v722_v20 = vmax.f32 %v579_v8, 0.0  ;;  %v740_v39 = vmax.f32 %v624_v19, 0.0  ;;  %v631_v19 = vadd.f32 %v2552_v27, %v2579_v47 }
 0x1d4   :  { %v1221_v57 = vpack.c.bf16 %v741_v24, %v740_v39 }
 0x1d6   :  { %2162 = vmatmul.msk.bf16.gmra.mxu1 %vm794_vm2, %v1220_v62 }
 0x1d7   :  { %v580_v37 = vpop.f32.mrf.mxu0 }
 0x1d8   :  { %v581_v45 = vadd.f32 %v2552_v27, %v580_v37 }
 0x1d9   :  { %v2877_v42 = vpop.f32.mrf.mxu3 }
 0x1da   :  { %v723_v1 = vmax.f32 %v581_v45, 0.0  ;;  %v629_v45 = vadd.f32 %v2552_v27, %v2572_v41 }
 0x1dc   :  { %v1063_v35 = vpack.c.bf16 %v723_v1, %v722_v20  ;;  %v742_v1 = vmax.f32 %v629_v45, 0.0 }
 0x1de   :  { %2129 = vmatmul.msk.bf16.gmra.mxu2 %vm794_vm2, %v1063_v35  ;;  %v743_v35 = vmax.f32 %v631_v19, 0.0 }
 0x1df   :  { %v583_v48 = vpop.f32.mrf.mxu0 }
 0x1e0   :  { %v584_v10 = vadd.f32 %v2552_v27, %v583_v48 }
 0x1e1   :  { %v964_v50 = vpop.f32.mrf.mxu3 }
 0x1e2   :  { %v2885_v6 = vadd.f32 %v964_v50, %v2818_v18  ;;  %v2369_v18 = vld [vmem:[%s3183_s3 + $0x70] sm:$0xff]  ;;  %v724_v8 = vmax.f32 %v584_v10, 0.0  ;;  %v1222_v50 = vpack.c.bf16 %v743_v35, %v742_v1 }
 0x1e3   :  { %1342 = vmatpush.bf16.msrb.mxu2 %v2369_v18  ;;  %v744_v18 = vmax.f32 %v634_v11, 0.0 }
 0x1e5   :  { %v1223_v19 = vpack.c.bf16 %v744_v18, %v744_v18 }
 0x1e6   :  { %2163 = vmatmul.msk.bf16.gmra.mxu1 %vm794_vm2, %v1221_v57 }
 0x1e7   :  { %v585_v33 = vpop.f32.mrf.mxu0 }
 0x1e8   :  { %v586_v59 = vadd.f32 %v2552_v27, %v585_v33 }
 0x1e9   :  { %v2896_v62 = vpop.f32.mrf.mxu3 }
 0x1ea   :  { %v725_v37 = vmax.f32 %v586_v59, 0.0 }
 0x1ec   :  { %v1064_v25 = vpack.c.bf16 %v725_v37, %v724_v8 }
 0x1ee   :  { %2130 = vmatmul.msk.bf16.gmra.mxu2 %vm794_vm2, %v1064_v25 }
 0x1ef   :  { %v588_v20 = vpop.f32.mrf.mxu0 }
 0x1f0   :  { %v589_v57 = vadd.f32 %v2552_v27, %v588_v20  ;;  %v636_v20 = vadd.f32 %v2552_v27, %v2605_v63  ;;  %v599_v63 = vadd.f32 %v2552_v27, %v2636_v23 }
 0x1f1   :  { %v969_v39 = vpop.f32.mrf.mxu3 }
 0x1f2   :  { %v2907_v24 = vadd.f32 %v969_v39, %v2838_v60  ;;  %v726_v47 = vmax.f32 %v589_v57, 0.0  ;;  %v745_v39 = vmax.f32 %v636_v20, 0.0 }
 0x1f3   :  { %v1028_v48 = vpop.f32.mrf.mxu1 }
 0x1f4   :  { %v2911_v61 = vadd.f32 %v1028_v48, %v2843_v22  ;;  %v1065_v59 = vpack.c.bf16 %v726_v47, %v726_v47  ;;  %v746_v48 = vmax.f32 %v639_v56, 0.0  ;;  %v649_v56 = vadd.f32 %v2552_v27, %v2653_v36 }
 0x1f6   :  { %2164 = vmatmul.msk.bf16.gmra.mxu1 %vm794_vm2, %v1222_v50 }
 0x1f7   :  { %v590_v41 = vpop.f32.mrf.mxu0 }
 0x1f8   :  { %v591_v60 = vadd.f32 %v2552_v27, %v590_v41  ;;  %v1298_v41 = vpack.c.bf16 %v746_v48, %v745_v39  ;;  %v750_v48 = vmax.f32 %v649_v56, 0.0 }
 0x1f9   :  { %v971_v10 = vpop.f32.mrf.mxu3 }
 0x1fa   :  { %v727_v37 = vmax.f32 %v591_v60, 0.0  ;;  %v730_v10 = vmax.f32 %v599_v63, 0.0  ;;  %v644_v60 = vadd.f32 %v2552_v27, %v2633_v21 }
 0x1fb   :  { %v2916_v33 = vpop.f32.mrf.mxu1 }
 0x1fe   :  { %2131 = vmatmul.msk.bf16.gmra.mxu2 %vm794_vm2, %v1065_v59  ;;  %v641_v59 = vadd.f32 %v2552_v27, %v2623_v12  ;;  %v604_v12 = vadd.f32 %v2552_v27, %v2662_v43 }
 0x1ff   :  { %v593_v8 = vpop.f32.mrf.mxu0 }
 0x200   :  { %v594_v22 = vadd.f32 %v2552_v27, %v593_v8  ;;  %v747_v23 = vmax.f32 %v641_v59, 0.0 }
 0x202   :  { %v728_v45 = vmax.f32 %v594_v22, 0.0  ;;  %v748_v22 = vmax.f32 %v644_v60, 0.0  ;;  %v611_v60 = vadd.f32 %v2552_v27, %v2692_v5 }
 0x203   :  { %v1033_v25 = vpop.f32.mrf.mxu1 }
 0x204   :  { %v1140_v1 = vpack.c.bf16 %v728_v45, %v727_v37  ;;  %v2926_v35 = vadd.f32 %v1033_v25, %v2859_v14  ;;  %v1299_v45 = vpack.c.bf16 %v748_v22, %v747_v23  ;;  %v732_v25 = vmax.f32 %v604_v12, 0.0 }
 0x206   :  { %2144 = vmatmul.msk.bf16.vlgmr.msra.gmra.mxu3 %vm794_vm2, %v1140_v1  ;;  %2165 = vmatmul.msk.bf16.gmra.mxu1 %vm794_vm2, %v1223_v19  ;;  %v601_v19 = vadd.f32 %v2552_v27, %v2650_v34 }
 0x207   :  { %v595_v50 = vpop.f32.mrf.mxu0 }
 0x208   :  { %v596_v47 = vadd.f32 %v2552_v27, %v595_v50  ;;  %v731_v21 = vmax.f32 %v601_v19, 0.0 }
 0x20a   :  { %v729_v14 = vmax.f32 %v596_v47, 0.0  ;;  %v1142_v1 = vpack.c.bf16 %v732_v25, %v731_v21  ;;  %v659_v21 = vadd.f32 %v2552_v27, %v2728_v44 }
 0x20b   :  { %v2930_v57 = vpop.f32.mrf.mxu1 }
 0x20c   :  { %v1141_v18 = vpack.c.bf16 %v730_v10, %v729_v14  ;;  %v754_v25 = vmax.f32 %v659_v21, 0.0 }
 0x20e   :  { %2178 = vmatmul.msk.bf16.vlgmr.msrb.gmra.mxu2 %vm794_vm2, %v1298_v41  ;;  %v606_v41 = vadd.f32 %v2552_v27, %v2673_v53 }
 0x210   :  { %v733_v36 = vmax.f32 %v606_v41, 0.0 }
 0x213   :  { %v1038_v11 = vpop.f32.mrf.mxu1 }
 0x214   :  { %v2944_v8 = vadd.f32 %v1038_v11, %v2872_v4  ;;  %v646_v4 = vadd.f32 %v2552_v27, %v2646_v29  ;;  %v609_v29 = vadd.f32 %v2552_v27, %v2686_v0  ;;  %v752_v11 = vmax.f32 %v654_v7, 0.0 }
 0x216   :  { %2145 = vmatmul.msk.bf16.gmra.mxu3 %vm794_vm2, %v1141_v18  ;;  %v749_v34 = vmax.f32 %v646_v4, 0.0  ;;  %v734_v47 = vmax.f32 %v609_v29, 0.0  ;;  %v735_v18 = vmax.f32 %v611_v60, 0.0  ;;  %v666_v29 = vadd.f32 %v2552_v27, %v2762_v15 }
 0x218   :  { %v1300_v50 = vpack.c.bf16 %v750_v48, %v749_v34  ;;  %v1143_v14 = vpack.c.bf16 %v734_v47, %v733_v36  ;;  %v1144_v22 = vpack.c.bf16 %v735_v18, %v735_v18  ;;  %v887_v34 = vadd.f32 %v2718_v32, %v2796_v16 }
 0x219   :  { %v757_v47 = vmax.f32 %v666_v29, 0.0 }
 0x21a   :  { %v976_v48 = vadd.f32 %v2864_v31, %v887_v34 }
 0x21b   :  { %v2947_v37 = vpop.f32.mrf.mxu1 }
 0x21c   :  { %v1055_v44 = vadd.f32 %v2930_v57, %v976_v48  ;;  %v2376_v48 = vld [vmem:[%s3185_s5 + $0x18] sm:$0xff] }
 0x21d   :  { %1510 = vmatpush.bf16.msra.mxu1 %v2376_v48 }
 0x21e   :  { %2179 = vmatmul.msk.bf16.gmra.mxu2 %vm794_vm2, %v1299_v45 }
 0x223   :  { %v1043_v20 = vpop.f32.mrf.mxu1 }
 0x224   :  { %v2959_v39 = vadd.f32 %v1043_v20, %v2885_v6  ;;  %v651_v6 = vadd.f32 %v2552_v27, %v2667_v49 }
 0x226   :  { %2146 = vmatmul.msk.bf16.gmra.mxu3 %vm794_vm2, %v1142_v1  ;;  %v751_v53 = vmax.f32 %v651_v6, 0.0 }
 0x228   :  { %v1301_v59 = vpack.c.bf16 %v752_v11, %v751_v53  ;;  %v671_v53 = vadd.f32 %v2552_v27, %v2777_v40  ;;  %v674_v40 = vadd.f32 %v2552_v27, %v2787_v58  ;;  %v2374_v58 = vld [vmem:[%s3185_s5 + $0x8] sm:$0xff] }
 0x229   :  { %1538 = vmatpush.bf16.msra.mxu2 %v2374_v58 }
 0x22b   :  { %v2962_v43 = vpop.f32.mrf.mxu1 }
 0x22e   :  { %2180 = vmatmul.msk.bf16.gmra.mxu2 %vm794_vm2, %v1300_v50 }
 0x233   :  { %v1048_v63 = vpop.f32.mrf.mxu1 }
 0x234   :  { %v2974_v10 = vadd.f32 %v1048_v63, %v2907_v24  ;;  %v656_v24 = vadd.f32 %v2552_v27, %v2689_v3  ;;  %v892_v63 = vadd.f32 %v2735_v51, %v2810_v54 }
 0x236   :  { %2147 = vmatmul.msk.bf16.gmra.mxu3 %vm794_vm2, %v1143_v14  ;;  %v753_v45 = vmax.f32 %v656_v24, 0.0  ;;  %v978_v6 = vadd.f32 %v2877_v42, %v892_v63 }
 0x238   :  { %v1302_v5 = vpack.c.bf16 %v753_v45, %v753_v45 }
 0x23b   :  { %v1050_v0 = vpop.f32.mrf.mxu1 }
 0x23c   :  { %v759_v0 = vmax.f32 %v671_v53, 0.0 }
 0x23e   :  { %2181 = vmatmul.msk.bf16.gmra.mxu2 %vm794_vm2, %v1301_v59 }
 0x241   :  { %v1107_v49 = vpop.f32.mrf.mxu2 }
 0x242   :  { %v2981_v23 = vadd.f32 %v1107_v49, %v2911_v61  ;;  %v661_v61 = vadd.f32 %v2552_v27, %v2737_v52 }
 0x243   :  { %v2983_v55 = vpop.f32.mrf.mxu1 }
 0x244   :  { %v755_v20 = vmax.f32 %v661_v61, 0.0 }
 0x246   :  { %2148 = vmatmul.msk.bf16.gmra.mxu3 %vm794_vm2, %v1144_v22  ;;  %v1377_v1 = vpack.c.bf16 %v755_v20, %v754_v25  ;;  %v760_v22 = vmax.f32 %v674_v40, 0.0 }
 0x249   :  { %v2988_v19 = vpop.f32.mrf.mxu2 }
 0x24b   :  { %v2990_v12 = vpop.f32.mrf.mxu1 }
 0x24e   :  { %2182 = vmatmul.msk.bf16.gmra.mxu2 %vm794_vm2, %v1302_v5 }
 0x251   :  { %v1112_v3 = vpop.f32.mrf.mxu2 }
 0x252   :  { %v2998_v4 = vadd.f32 %v1112_v3, %v2926_v35  ;;  %v664_v35 = vadd.f32 %v2552_v27, %v2750_v2  ;;  %v1057_v2 = vadd.f32 %v2947_v37, %v978_v6  ;;  %v897_v37 = vadd.f32 %v2760_v13, %v2827_v26 }
 0x253   :  { %v3000_v56 = vpop.f32.mrf.mxu1 }
 0x254   :  { %v756_v36 = vmax.f32 %v664_v35, 0.0  ;;  %v980_v60 = vadd.f32 %v2896_v62, %v897_v37 }
 0x256   :  { %2195 = vmatmul.msk.bf16.vlgmr.msrb.gmra.mxu3 %vm794_vm2, %v1377_v1  ;;  %v1378_v57 = vpack.c.bf16 %v757_v47, %v756_v36  ;;  %v1059_v18 = vadd.f32 %v2962_v43, %v980_v60 }
 0x259   :  { %v1114_v52 = vpop.f32.mrf.mxu2 }
 0x25a   :  { %v3007_v50 = vadd.f32 %v1114_v52, %v1055_v44 }
 0x25b   :  { %v3009_v41 = vpop.f32.mrf.mxu1 }
 0x261   :  { %v1117_v32 = vpop.f32.mrf.mxu2 }
 0x262   :  { %v3016_v16 = vadd.f32 %v1117_v32, %v2944_v8  ;;  %v669_v8 = vadd.f32 %v2552_v27, %v2770_v28 }
 0x263   :  { %v3018_v31 = vpop.f32.mrf.mxu1 }
 0x264   :  { %v758_v11 = vmax.f32 %v669_v8, 0.0 }
 0x266   :  { %2196 = vmatmul.msk.bf16.gmra.mxu3 %vm794_vm2, %v1378_v57  ;;  %v1379_v42 = vpack.c.bf16 %v759_v0, %v758_v11 }
 0x269   :  { %v1119_v7 = vpop.f32.mrf.mxu2 }
 0x26a   :  { %v1136_v15 = vadd.f32 %v1119_v7, %v1057_v2 }
 0x26b   :  { %v3025_v14 = vpop.f32.mrf.mxu1 }
 0x271   :  { %v1122_v59 = vpop.f32.mrf.mxu2 }
 0x272   :  { %v1137_v51 = vadd.f32 %v1122_v59, %v2959_v39  ;;  %v676_v39 = vadd.f32 %v2552_v27, %v2794_v9  ;;  %v679_v9 = vadd.f32 %v2552_v27, %v2803_v30 }
 0x273   :  { %v1280_v54 = vpop.f32.mrf.mxu1 }
 0x274   :  { %v761_v45 = vmax.f32 %v676_v39, 0.0  ;;  %v762_v20 = vmax.f32 %v679_v9, 0.0 }
 0x276   :  { %2197 = vmatmul.msk.bf16.gmra.mxu3 %vm794_vm2, %v1379_v42  ;;  %v1380_v62 = vpack.c.bf16 %v761_v45, %v760_v22  ;;  %v1381_v44 = vpack.c.bf16 %v762_v20, %v762_v20 }
 0x279   :  { %v1124_v28 = vpop.f32.mrf.mxu2 }
 0x27a   :  { %v1138_v49 = vadd.f32 %v1124_v28, %v1059_v18 }
 0x27b   :  { %v3037_v24 = vpop.f32.mrf.mxu1 }
 0x281   :  { %v1127_v5 = vpop.f32.mrf.mxu2 }
 0x282   :  { %v1139_v13 = vadd.f32 %v1127_v5, %v2974_v10 }
 0x283   :  { %v1285_v26 = vpop.f32.mrf.mxu1 }
 0x286   :  { %2198 = vmatmul.msk.bf16.gmra.mxu3 %vm794_vm2, %v1380_v62  ;;  %v2380_v62 = vld [vmem:[%s3185_s5 + $0x38] sm:$0xff] }
 0x289   :  { %v1129_v43 = vpop.f32.mrf.mxu2  ;;  %v1186_v21 = vpop.f32.mrf.mxu3 }
 0x28a   :  { %v1210_v61 = vadd.f32 %v1186_v21, %v2981_v23  ;;  %v2378_v23 = vld [vmem:[%s3185_s5 + $0x28] sm:$0xff] }
 0x28b   :  { %v1287_v25 = vpop.f32.mrf.mxu1  ;;  %1572 = vmatpush.bf16.msra.mxu3 %v2378_v23 }
 0x28c   :  { %v1289_v10 = vadd.f32 %v2983_v55, %v1210_v61  ;;  %v3108_v61 = vld [vmem:[%s3184_s4] ss:$0 sm:$0xff] }
 0x291   :  { %v3052_v3 = vpop.f32.mrf.mxu3  ;;  %v1344_v1 = vpop.f32.mrf.mxu2 }
 0x292   :  { %v3054_v34 = vadd.f32 %v1344_v1, %v1289_v10 }
 0x296   :  { %2199 = vmatmul.msk.bf16.gmra.mxu3 %vm794_vm2, %v1381_v44  ;;  %v2383_v44 = vld [vmem:[%s3185_s5 + $0x50] sm:$0xff] }
 0x299   :  { %v1191_v27 = vpop.f32.mrf.mxu3  ;;  %v1346_v30 = vpop.f32.mrf.mxu2 }
 0x29a   :  { %v1212_v55 = vadd.f32 %v1191_v27, %v2998_v4 }
 0x29c   :  { %v1291_v52 = vadd.f32 %v3000_v56, %v1212_v55  ;;  %v2386_v55 = vld [vmem:[%s3185_s5 + $0x68] sm:$0xff] }
 0x2a1   :  { %v1193_v35 = vpop.f32.mrf.mxu3  ;;  %v1349_v29 = vpop.f32.mrf.mxu2 }
 0x2a2   :  { %v1213_v36 = vadd.f32 %v1193_v35, %v3007_v50  ;;  %v3066_v47 = vadd.f32 %v1349_v29, %v1291_v52  ;;  %v2373_v50 = vld [vmem:[%s3185_s5] sm:$0xff] }
 0x2a3   :  { %1539 = vmatpush.bf16.msra.mxu2 %v2373_v50  ;;  %v2385_v29 = vld [vmem:[%s3185_s5 + $0x60] sm:$0xff] }
 0x2a4   :  { %v1292_v32 = vadd.f32 %v3009_v41, %v1213_v36 }
 0x2a9   :  { %v1196_v57 = vpop.f32.mrf.mxu3  ;;  %v1351_v63 = vpop.f32.mrf.mxu2 }
 0x2aa   :  { %v1214_v6 = vadd.f32 %v1196_v57, %v3016_v16  ;;  %v3070_v2 = vadd.f32 %v1351_v63, %v1292_v32  ;;  %v2388_v57 = vld [vmem:[%s3185_s5 + $0x78] sm:$0xff] }
 0x2ac   :  { %v1293_v7 = vadd.f32 %v3018_v31, %v1214_v6  ;;  %v2377_v31 = vld [vmem:[%s3185_s5 + $0x20] sm:$0xff] }
 0x2ad   :  { %1573 = vmatpush.bf16.msra.mxu3 %v2377_v31 }
 0x2b1   :  { %v1198_v8 = vpop.f32.mrf.mxu3  ;;  %v1354_v4 = vpop.f32.mrf.mxu2 }
 0x2b2   :  { %v1215_v53 = vadd.f32 %v1198_v8, %v1136_v15  ;;  %v3073_v56 = vadd.f32 %v1354_v4, %v1293_v7  ;;  %v2375_v15 = vld [vmem:[%s3185_s5 + $0x10] sm:$0xff] }
 0x2b3   :  { %1511 = vmatpush.bf16.msra.mxu1 %v2375_v15  ;;  %v2387_v7 = vld [vmem:[%s3185_s5 + $0x70] sm:$0xff] }
 0x2b4   :  { %v1294_v41 = vadd.f32 %v3025_v14, %v1215_v53  ;;  %v2390_v53 = vld [vmem:[%s3185_s5 + $0x88] sm:$0xff] }
 0x2b7   :  { %1607 = vmatpush.bf16.msrb.mxu1 %v2380_v62 }
 0x2b9   :  { %v1201_v11 = vpop.f32.mrf.mxu3  ;;  %v1356_v0 = vpop.f32.mrf.mxu2 }
 0x2ba   :  { %v1216_v59 = vadd.f32 %v1201_v11, %v1137_v51  ;;  %v3079_v16 = vadd.f32 %v1356_v0, %v1294_v41  ;;  %v2389_v11 = vld [vmem:[%s3185_s5 + $0x80] sm:$0xff] }
 0x2bc   :  { %v1295_v42 = vadd.f32 %v1280_v54, %v1216_v59 }
 0x2c1   :  { %v1203_v37 = vpop.f32.mrf.mxu3  ;;  %v1359_v60 = vpop.f32.mrf.mxu2 }
 0x2c2   :  { %v1217_v18 = vadd.f32 %v1203_v37, %v1138_v49  ;;  %v3087_v28 = vadd.f32 %v1359_v60, %v1295_v42  ;;  %v882_v49 = vadd.f32 %v2705_v17, %v2779_v46 }
 0x2c4   :  { %v1296_v14 = vadd.f32 %v3037_v24, %v1217_v18  ;;  %v974_v24 = vadd.f32 %v2848_v38, %v882_v49  ;;  %v2382_v38 = vld [vmem:[%s3185_s5 + $0x48] sm:$0xff] }
 0x2c5   :  { %1642 = vmatpush.bf16.msrb.mxu2 %v2382_v38 }
 0x2c9   :  { %v1206_v51 = vpop.f32.mrf.mxu3  ;;  %v1361_v40 = vpop.f32.mrf.mxu2 }
 0x2ca   :  { %v1218_v54 = vadd.f32 %v1206_v51, %v1139_v13  ;;  %v3090_v39 = vadd.f32 %v1361_v40, %v1296_v14  ;;  %v2379_v13 = vld [vmem:[%s3185_s5 + $0x30] sm:$0xff] }
 0x2cb   :  { %1608 = vmatpush.bf16.msrb.mxu1 %v2379_v13 }
 0x2cc   :  { %v1297_v22 = vadd.f32 %v1285_v26, %v1218_v54  ;;  %v1053_v26 = vadd.f32 %v2916_v33, %v974_v24 }
 0x2ce   :  { %v1132_v21 = vadd.f32 %v2988_v19, %v1053_v26  ;;  %v2381_v19 = vld [vmem:[%s3185_s5 + $0x40] sm:$0xff] }
 0x2cf   :  { %1643 = vmatpush.bf16.msrb.mxu2 %v2381_v19 }
 0x2d0   :  { %v1211_v58 = vadd.f32 %v3052_v3, %v1132_v21  ;;  %v2384_v3 = vld [vmem:[%s3185_s5 + $0x58] sm:$0xff] }
 0x2d1   :  { %v1208_v45 = vpop.f32.mrf.mxu3  ;;  %v1364_v5 = vpop.f32.mrf.mxu2  ;;  %1677 = vmatpush.bf16.msrb.mxu3 %v2384_v3 }
 0x2d2   :  { %v3097_v43 = vadd.f32 %v1364_v5, %v1297_v22  ;;  %v1290_v9 = vadd.f32 %v2990_v12, %v1211_v58 }
 0x2d4   :  { %v1369_v10 = vadd.f32 %v1346_v30, %v1290_v9 }
 0x2d5   :  { %1678 = vmatpush.bf16.msrb.mxu3 %v2383_v44 }
 0x2d9   :  { %v1366_v17 = vpop.f32.mrf.mxu2  ;;  %v1423_v46 = vpop.f32.mrf.mxu3 }
 0x2da   :  { %v1447_v25 = vadd.f32 %v1423_v46, %v3054_v34 }
 0x2dc   :  { %v1460_v33 = vadd.f32 %v3108_v61, %v1447_v25 }
 0x2de   :  { %v1469_v20 = vmax.f32 %v1460_v33, 0.0 }
 0x2e0   :  { %v1478_v1 = vpack.c.bf16 %v1469_v20, %v1469_v20 }
 0x2e1   :  { %v1425_v23 = vpop.f32.mrf.mxu3 }
 0x2e2   :  { %v1448_v48 = vadd.f32 %v1425_v23, %v1369_v10  ;;  %2221 = vmatmul.msk.bf16.vlgmr.msra.gmra.mxu2 %vm794_vm2, %v1478_v1 }
 0x2e3   :  { %1747 = vmatpush.bf16.msra.mxu2 %v2388_v57 }
 0x2e4   :  { %v1461_v34 = vadd.f32 %v3108_v61, %v1448_v48 }
 0x2e6   :  { %v1470_v12 = vmax.f32 %v1461_v34, 0.0 }
 0x2e7   :  { %1748 = vmatpush.bf16.msra.mxu2 %v2387_v7 }
 0x2e8   :  { %v1483_v27 = vpack.c.bf16 %v1470_v12, %v1470_v12 }
 0x2e9   :  { %v1428_v30 = vpop.f32.mrf.mxu3 }
 0x2ea   :  { %v1449_v52 = vadd.f32 %v1428_v30, %v3066_v47  ;;  %2212 = vmatmul.msk.bf16.vlgmr.msra.gmra.mxu1 %vm794_vm2, %v1483_v27  ;;  %v2403_v30 = vld [vmem:[%s3186_s6] ss:$0 sm:$0xff] }
 0x2eb   :  { %1712 = vmatpush.bf16.msra.mxu1 %v2386_v55 }
 0x2ec   :  { %v1462_v35 = vadd.f32 %v3108_v61, %v1449_v52 }
 0x2ee   :  { %v1471_v36 = vmax.f32 %v1462_v35, 0.0 }
 0x2ef   :  { %1713 = vmatpush.bf16.msra.mxu1 %v2385_v29 }
 0x2f0   :  { %v1545_v32 = vpack.c.bf16 %v1471_v36, %v1471_v36 }
 0x2f1   :  { %v1430_v63 = vpop.f32.mrf.mxu3 }
 0x2f2   :  { %v1450_v6 = vadd.f32 %v1430_v63, %v3070_v2  ;;  %2234 = vmatmul.msk.bf16.vlgmr.msra.gmra.mxu3 %vm794_vm2, %v1545_v32  ;;  %v2412_v32 = vmov 50.0  }
 0x2f3   :  { %1782 = vmatpush.bf16.msra.mxu3 %v2390_v53  ;;  %2406 = vrcp.f32 %v2412_v32 }
 0x2f4   :  { %v1463_v47 = vadd.f32 %v3108_v61, %v1450_v6 }
 0x2f6   :  { %v1472_v8 = vmax.f32 %v1463_v47, 0.0 }
 0x2f7   :  { %1783 = vmatpush.bf16.msra.mxu3 %v2389_v11 }
 0x2f8   :  { %v1580_v4 = vpack.c.bf16 %v1472_v8, %v1472_v8  ;;  %v1795_v8 = vlaneseq }
 0x2f9   :  { %v1433_v50 = vpop.f32.mrf.mxu3  ;;  %v2407_v57 = vpop.eup %2406 }
 0x2fa   :  { %v1451_v41 = vadd.f32 %v1433_v50, %v3073_v56  ;;  %2247 = vmatmul.msk.bf16.vlgmr.msrb.gmra.mxu1 %vm794_vm2, %v1580_v4  ;;  %v1801_v63 = vmul.f32 50.0, %v2407_v57  ;;  %vm1805_vm3 = vweird.f32 %v2407_v57  ;;  %v1796_v53 = vand.u32 127, %v1795_v8 }
 0x2fc   :  { %v1464_v2 = vadd.f32 %v3108_v61, %v1451_v41  ;;  %v1802_v6 = vsub.f32 1.0, %v1801_v63  ;;  %vm1797_vm4 = vcmp.lt.s32.totalorder %v1796_v53, 50 }
 0x2fe   :  { %v1473_v0 = vmax.f32 %v1464_v2, 0.0  ;;  %v1803_v47 = vmul.f32 %v2407_v57, %v1802_v6 }
 0x300   :  { %v1615_v59 = vpack.c.bf16 %v1473_v0, %v1473_v0  ;;  %v1804_v7 = vadd.f32 %v2407_v57, %v1803_v47 }
 0x301   :  { %v1435_v42 = vpop.f32.mrf.mxu3 }
 0x302   :  { %v1452_v31 = vadd.f32 %v1435_v42, %v3079_v16  ;;  %2260 = vmatmul.msk.bf16.vlgmr.msrb.gmra.mxu2 %vm794_vm2, %v1615_v59  ;;  %v1806_v4 = vsel %vm1805_vm3, %v2407_v57, %v1804_v7 }
 0x304   :  { %v1465_v15 = vadd.f32 %v3108_v61, %v1452_v31 }
 0x306   :  { %v1474_v56 = vmax.f32 %v1465_v15, 0.0 }
 0x308   :  { %v1650_v37 = vpack.c.bf16 %v1474_v56, %v1474_v56 }
 0x309   :  { %v1438_v60 = vpop.f32.mrf.mxu3 }
 0x30a   :  { %v1453_v18 = vadd.f32 %v1438_v60, %v3087_v28  ;;  %2273 = vmatmul.msk.bf16.vlgmr.msrb.gmra.mxu3 %vm794_vm2, %v1650_v37 }
 0x30c   :  { %v1466_v14 = vadd.f32 %v3108_v61, %v1453_v18 }
 0x30e   :  { %v1475_v51 = vmax.f32 %v1466_v14, 0.0 }
 0x310   :  { %v1685_v40 = vpack.c.bf16 %v1475_v51, %v1475_v51  ;;  %v2404_v51 = vld [vmem:[%s3187_s7] ss:$0 sm:$0xff] }
 0x311   :  { %v1440_v54 = vpop.f32.mrf.mxu3 }
 0x312   :  { %v1454_v22 = vadd.f32 %v1440_v54, %v3090_v39  ;;  %2286 = vmatmul.msk.bf16.vlgmr.msra.gmra.mxu1 %vm794_vm2, %v1685_v40  ;;  %v2405_v54 = vld [vmem:[%s3188_s8] ss:$0 sm:$0xff] }
 0x314   :  { %v1467_v16 = vadd.f32 %v3108_v61, %v1454_v22 }
 0x316   :  { %v1476_v45 = vmax.f32 %v1467_v16, 0.0 }
 0x318   :  { %v1720_v5 = vpack.c.bf16 %v1476_v45, %v1476_v45 }
 0x319   :  { %v1443_v62 = vpop.f32.mrf.mxu3 }
 0x31a   :  { %v1455_v49 = vadd.f32 %v1443_v62, %v3097_v43  ;;  %2299 = vmatmul.msk.bf16.vlgmr.msra.gmra.mxu2 %vm794_vm2, %v1720_v5 }
 0x31c   :  { %v1468_v28 = vadd.f32 %v3108_v61, %v1455_v49 }
 0x31e   :  { %v1477_v24 = vmax.f32 %v1468_v28, 0.0 }
 0x320   :  { %v1755_v13 = vpack.c.bf16 %v1477_v24, %v1477_v24 }
 0x321   :  { %v1445_v26 = vpop.f32.mrf.mxu3 }
 0x322   :  { %2312 = vmatmul.msk.bf16.vlgmr.msra.gmra.mxu3 %vm794_vm2, %v1755_v13 }
 0x365   :  { %v1541_v21 = vpop.f32.mrf.mxu2 }
 0x367   :  { %v1513_v39 = vpop.f32.mrf.mxu1 }
 0x368   :  { %v1542_v10 = vadd.f32 %v1541_v21, %v1513_v39 }
 0x36d   :  { %v1543_v17 = vpop.f32.mrf.mxu2 }
 0x36f   :  { %v1515_v46 = vpop.f32.mrf.mxu1 }
 0x375   :  { %v1575_v38 = vpop.f32.mrf.mxu3 }
 0x376   :  { %v1579_v61 = vadd.f32 %v1575_v38, %v1542_v10 }
 0x377   :  { %v1610_v58 = vpop.f32.mrf.mxu1 }
 0x378   :  { %v1614_v3 = vadd.f32 %v1610_v58, %v1579_v61 }
 0x37d   :  { %v1577_v25 = vpop.f32.mrf.mxu3 }
 0x37f   :  { %v1612_v33 = vpop.f32.mrf.mxu1 }
 0x385   :  { %v1645_v19 = vpop.f32.mrf.mxu2 }
 0x386   :  { %v1649_v48 = vadd.f32 %v1645_v19, %v1614_v3 }
 0x38d   :  { %v1647_v9 = vpop.f32.mrf.mxu2  ;;  %v1680_v43 = vpop.f32.mrf.mxu3 }
 0x38e   :  { %v1684_v44 = vadd.f32 %v1680_v43, %v1649_v48 }
 0x38f   :  { %v1715_v20 = vpop.f32.mrf.mxu1 }
 0x390   :  { %v1719_v12 = vadd.f32 %v1715_v20, %v1684_v44 }
 0x395   :  { %v1682_v1 = vpop.f32.mrf.mxu3 }
 0x397   :  { %v1717_v23 = vpop.f32.mrf.mxu1 }
 0x39d   :  { %v1750_v34 = vpop.f32.mrf.mxu2 }
 0x39e   :  { %v1754_v27 = vadd.f32 %v1750_v34, %v1719_v12 }
 0x3a5   :  { %v1752_v55 = vpop.f32.mrf.mxu2  ;;  %v1785_v52 = vpop.f32.mrf.mxu3 }
 0x3a6   :  { %v1789_v35 = vadd.f32 %v1785_v52, %v1754_v27 }
 0x3a8   :  { %v1794_v29 = vadd.f32 %v2403_v30, %v1789_v35 }
 0x3aa   :  { %1798 = vadd.xlane.f32.xlu0 %v1794_v29 }
 0x3ad   :  { %v1787_v36 = vpop.f32.mrf.mxu3 }
 0x41d   :  { %v1799_v50 = vpop.xlane.xlu0 %1798 }
 0x41e   :  { %v1807_v41 = vmul.f32 %v1806_v4, %v1799_v50 }
 0x420   :  { %v1808_v2 = vsub.f32 %v1794_v29, %v1807_v41 }
 0x422   :  { %v1809_v11 = vsel %vm1797_vm4, %v1808_v2, 0.0 }
 0x423   :  { %v1810_v0 = vmul.f32 %v1809_v11, %v1809_v11 }
 0x425   :  { %1811 = vadd.xlane.f32.xlu0 %v1810_v0 }
 0x498   :  { %v1812_v59 = vpop.xlane.xlu0 %1811 }
 0x499   :  { %v1813_v42 = vmul.f32 %v1812_v59, %v1806_v4 }
 0x49b   :  { %v1814_v31 = vadd.f32 1e-05, %v1813_v42 }
 0x49d   :  { %2408 = vrsqrt.f32 %v1814_v31  ;;  %vm1821_vm6 = vweird.f32 %v1814_v31 }
 0x4a3   :  { %v2409_v15 = vpop.eup %2408 }
 0x4a4   :  { %v1816_v56 = vmul.f32 %v2409_v15, %v1814_v31  ;;  %vm1822_vm5 = vweird.f32 %v2409_v15 }
 0x4a5   :  { %vm1823_vm7 = vmor %vm1821_vm6, %vm1822_vm5 }
 0x4a6   :  { %v1817_v37 = vmul.f32 %v2409_v15, %v1816_v56 }
 0x4a8   :  { %v1818_v60 = vmul.f32 0.5, %v1817_v37 }
 0x4aa   :  { %v1819_v18 = vsub.f32 1.5, %v1818_v60 }
 0x4ac   :  { %v1820_v14 = vmul.f32 %v2409_v15, %v1819_v18 }
 0x4ae   :  { %v1824_v40 = vsel %vm1823_vm7, %v2409_v15, %v1820_v14 }
 0x4af   :  { %v1825_v22 = vmul.f32 %v1824_v40, %v1809_v11 }
 0x4b1   :  { %v1830_v16 = vmul.f32 %v2404_v51, %v1825_v22 }
 0x4b3   :  { %v1835_v45 = vadd.f32 %v2405_v54, %v1830_v16 }
 0x4b5   :  { %2410 = vtanh.f32 %v1835_v45 }
 0x4bb   :  { %v2411_v5 = vpop.eup %2410 }
 0x4bc   :  { %1837 = vst [vmem:[%s3189_s9] sm:$0xff] %v2411_v5 }

</bundles_post_ra>
